<compile_context>
chip_gen: v6e
topology: v6e:2x2x1
jax: 0.10.0
libtpu: 0.0.40
codegen_flags: <defaults>
</compile_context>

<pallas_src>
import numpy as np
import jax
import jax.numpy as jnp
from jax import lax
from jax.experimental import pallas as pl
from jax.experimental.pallas import tpu as pltpu


def _round_up(v, m):
    return (v + m - 1) // m * m


def _mlp_kernel(x_ref, w1_ref, w2_ref, bw_ref, b3_ref, o_ref):
    """Fused 3-layer MLP on one batch tile; batch on the lane axis.

    x_ref  : (tile_b, in_p)   input tile (row-major, zero-padded)
    w1_ref : (hid_p, in_p)    fc1 weight, PyTorch (out, in) layout
    w2_ref : (hid_p, hid_p)   fc2 weight
    bw_ref : (hid_p, 3)       packed f32 columns: [b1, b2, w3]
    b3_ref : (1, 1)           scalar bias, lives in SMEM
    o_ref  : (1, tile_b)      lane-dense output (one scalar per batch row)
    """
    # fc1 + relu: contract w1's in-axis against the tile's in-axis so the
    # result is already (hid_p, tile_b) -- no transposed x copy needed.
    h1 = lax.dot_general(
        w1_ref[...], x_ref[...],
        dimension_numbers=(((1,), (1,)), ((), ())),
        preferred_element_type=jnp.float32)
    bw = bw_ref[...]
    h1 = jnp.maximum(h1 + bw[:, 0:1], 0.0)

    # fc2 + relu (MXU, f32 accumulation)
    h2 = jnp.dot(w2_ref[...], h1.astype(w2_ref.dtype),
                 preferred_element_type=jnp.float32)
    h2 = jnp.maximum(h2 + bw[:, 1:2], 0.0)

    # fc3 (single output feature): VPU mul + sublane (XLU) reduce -> (1, tile_b)
    y = jnp.sum(h2 * bw[:, 2:3], axis=0, keepdims=True) + b3_ref[0, 0]
    o_ref[...] = y.astype(o_ref.dtype)


def feedforward_nn(x, params, *, tile_b=None, compute_dtype=jnp.bfloat16):
    """x: [B, input_dim] float32. params: PyTorch-layout weights/biases.

    params["w1"]: (hidden, input_dim)  params["b1"]: (hidden,)
    params["w2"]: (hidden, hidden)     params["b2"]: (hidden,)
    params["w3"]: (1, hidden)          params["b3"]: (1,)
    compute_dtype: jnp.bfloat16 (default; MXU-native, f32 accumulation) or
                   jnp.float32 for bit-exact matching of the f32 reference.
    """
    B, input_dim = x.shape
    hidden = params["w1"].shape[0]

    # Lane-align feature dims.
    in_p = _round_up(input_dim, 128)
    hid_p = _round_up(hidden, 128)

    # Batch tile: 256-lane floor (256-wide MXU on v6e/v7x), up to 1024, and an
    # even tile count when >1 tile so both v7x TensorCores get equal work.
    if tile_b is None:
        b_aligned = _round_up(B, 256)
        nt = max(1, -(-b_aligned // 1024))
        if nt > 1 and nt % 2 == 1:
            nt += 1
        tile_b = max(256, min(1024, _round_up(-(-b_aligned // nt), 256)))
    B_p = _round_up(B, tile_b)
    num_tiles = B_p // tile_b

    f32 = jnp.float32
    # Zero-pad operands. Padding is exact: padded hidden rows stay 0 through
    # bias+relu (their packed bias entries are 0) and contribute 0 to the
    # final reduction; padded batch rows are sliced off before returning.
    x_p = jnp.pad(x, ((0, B_p - B), (0, in_p - input_dim))).astype(compute_dtype)
    w1 = jnp.pad(params["w1"], ((0, hid_p - hidden), (0, in_p - input_dim))
                 ).astype(compute_dtype)
    w2 = jnp.pad(params["w2"], ((0, hid_p - hidden), (0, hid_p - hidden))
                 ).astype(compute_dtype)
    # Pack b1, b2, w3 into one (hid_p, 3) f32 buffer (one lane-padded block
    # instead of three). fc3 math happens in f32 anyway (h2 is f32).
    bw = jnp.stack(
        [jnp.pad(params["b1"].astype(f32), (0, hid_p - hidden)),
         jnp.pad(params["b2"].astype(f32), (0, hid_p - hidden)),
         jnp.pad(params["w3"].astype(f32).reshape(hidden), (0, hid_p - hidden))],
        axis=1)
    b3 = params["b3"].astype(f32).reshape(1, 1)

    # VMEM budget: double-buffered x/out tiles, single-buffered resident
    # weights, packed column buffer, live activations (h1/h2 f32 + bf16 copy).
    wsz = np.dtype(compute_dtype).itemsize
    est = 2 * tile_b * in_p * wsz                       # x tile (2 bufs)
    est += 2 * 8 * tile_b * 4                           # out tile (8 sublanes)
    est += (hid_p * in_p + hid_p * hid_p) * wsz         # w1 + w2 (single-buf)
    est += hid_p * 128 * 4                              # packed b1/b2/w3
    est += (2 * 4 + wsz) * hid_p * tile_b               # h1, h2 f32 + h1 cast
    try:
        phys_vmem = pltpu.get_tpu_info().vmem_capacity_bytes
    except Exception:
        phys_vmem = 64 * 1024 * 1024
    vmem_cap = int(phys_vmem * 0.8)                     # leave compiler headroom
    vmem_limit = min(vmem_cap, max(32 * 1024 * 1024, int(1.5 * est)))

    flops = 2 * B_p * (in_p * hid_p + hid_p * hid_p + hid_p)
    bytes_accessed = (x_p.size * wsz + (w1.size + w2.size) * wsz
                      + bw.size * 4 + 4 + B_p * 4)

    def _build(use_buffered):
        def rep(shape):
            if use_buffered:
                return pl.BlockSpec(shape, lambda i: (0, 0),
                                    pipeline_mode=pl.Buffered(1))
            return pl.BlockSpec(shape, lambda i: (0, 0))

        return pl.pallas_call(
            _mlp_kernel,
            out_shape=jax.ShapeDtypeStruct((1, B_p), jnp.float32),
            grid=(num_tiles,),
            in_specs=[
                pl.BlockSpec((tile_b, in_p), lambda i: (i, 0)),    # x batch tile
                rep((hid_p, in_p)),                                # w1 (resident)
                rep((hid_p, hid_p)),                               # w2 (resident)
                rep((hid_p, 3)),                                   # packed b1/b2/w3
                pl.BlockSpec(memory_space=pltpu.MemorySpace.SMEM), # b3 scalar
            ],
            out_specs=pl.BlockSpec((1, tile_b), lambda i: (0, i)), # lane-dense out
            compiler_params=pltpu.CompilerParams(
                dimension_semantics=("parallel",),
                vmem_limit_bytes=vmem_limit,
            ),
            cost_estimate=pl.CostEstimate(
                flops=flops, transcendentals=0, bytes_accessed=bytes_accessed),
        )

    try:
        out = _build(True)(x_p, w1, w2, bw, b3)
    except Exception:
        # Fallback: some builds may reject Buffered(1); double-buffering the
        # grid-invariant blocks is correct, just uses 2x weight VMEM.
        out = _build(False)(x_p, w1, w2, bw, b3)

    # Layout plumbing back to the module's (B, 1) output.
    return out[0, :B].reshape(B, 1)


def init_params(key, input_dim, hidden_dim):
    """Deterministic init mimicking nn.Linear (weights stored as (out, in))."""
    k1, k2, k3, k4, k5, k6 = jax.random.split(key, 6)
    s1 = 1.0 / jnp.sqrt(input_dim)
    s2 = 1.0 / jnp.sqrt(hidden_dim)
    return {
        "w1": jax.random.uniform(k1, (hidden_dim, input_dim), jnp.float32, -s1, s1),
        "b1": jax.random.uniform(k2, (hidden_dim,), jnp.float32, -s1, s1),
        "w2": jax.random.uniform(k3, (hidden_dim, hidden_dim), jnp.float32, -s2, s2),
        "b2": jax.random.uniform(k4, (hidden_dim,), jnp.float32, -s2, s2),
        "w3": jax.random.uniform(k5, (1, hidden_dim), jnp.float32, -s2, s2),
        "b3": jax.random.uniform(k6, (1,), jnp.float32, -s2, s2),
    }


def _reference(x, p):
    h1 = jnp.maximum(x @ p["w1"].T + p["b1"], 0.0)
    h2 = jnp.maximum(h1 @ p["w2"].T + p["b2"], 0.0)
    return h2 @ p["w3"].T + p["b3"]


if __name__ == "__main__":
    key = jax.random.PRNGKey(0)
    kx, kp = jax.random.split(key)

    batch, input_dim, hidden_dim = 8, 16, 32
    x = jax.random.normal(kx, (batch, input_dim), jnp.float32)
    params = init_params(kp, input_dim, hidden_dim)
    ref = _reference(x, params)

    # f32 path: must match the float32 reference tightly.
    out_f32 = jax.block_until_ready(
        feedforward_nn(x, params, compute_dtype=jnp.float32))
    assert out_f32.shape == (batch, 1)
    assert jnp.allclose(out_f32, ref, atol=1e-5, rtol=1e-5), (
        f"f32 max err {jnp.max(jnp.abs(out_f32 - ref))}")

    # Default bf16 path (MXU-native, f32 accumulation): loose tolerance.
    out_bf16 = jax.block_until_ready(feedforward_nn(x, params))
    assert out_bf16.shape == (batch, 1)
    assert jnp.allclose(out_bf16, ref, atol=5e-2, rtol=5e-2), (
        f"bf16 max err {jnp.max(jnp.abs(out_bf16 - ref))}")

    print("KERNEL_OK")
</pallas_src>

<mosaic_0001>
module attributes {stable_mosaic.version = 11 : i64} {
  func.func @_mlp_kernel(%arg0: i32, %arg1: memref<256x128xf32, #tpu.memory_space<vmem>>, %arg2: memref<128x128xf32, #tpu.memory_space<vmem>>, %arg3: memref<128x128xf32, #tpu.memory_space<vmem>>, %arg4: memref<128x3xf32, #tpu.memory_space<vmem>>, %arg5: memref<1x1xf32, #tpu.memory_space<smem>>, %arg6: memref<1x256xf32, #tpu.memory_space<vmem>>) attributes {dimension_semantics = [#tpu.dimension_semantics<parallel>], iteration_bounds = array<i64: 1>, scalar_prefetch = 0 : i64, scratch_operands = 0 : i64, tpu.core_type = #tpu.core_type<tc>, window_params = [{transform_indices = @transform_0, window_bounds = array<i64: 256, 128>}, {pipeline_mode = #tpu.pipeline_mode<synchronous>, transform_indices = @transform_1, window_bounds = array<i64: 128, 128>}, {pipeline_mode = #tpu.pipeline_mode<synchronous>, transform_indices = @transform_2, window_bounds = array<i64: 128, 128>}, {pipeline_mode = #tpu.pipeline_mode<synchronous>, transform_indices = @transform_3, window_bounds = array<i64: 128, 3>}, {transform_indices = @transform_4, window_bounds = array<i64: 1, 1>}, {transform_indices = @transform_5, window_bounds = array<i64: 1, 256>}]} {
    %c0 = arith.constant 0 : index
    %c0_0 = arith.constant 0 : index
    %0 = vector.load %arg2[%c0, %c0_0] : memref<128x128xf32, #tpu.memory_space<vmem>>, vector<128x128xf32>
    %c0_1 = arith.constant 0 : index
    %c0_2 = arith.constant 0 : index
    %1 = vector.load %arg1[%c0_1, %c0_2] : memref<256x128xf32, #tpu.memory_space<vmem>>, vector<256x128xf32>
    %cst = arith.constant dense<0.000000e+00> : vector<128x256xf32>
    %2 = tpu.matmul %0, %1, %cst {dimension_numbers = #tpu.dot_dimension_numbers<[1], [1], [0], [0], [0, 0, 1, 0], [], []>} : vector<128x128xf32>, vector<256x128xf32>, vector<128x256xf32> -> vector<128x256xf32>
    %c0_3 = arith.constant 0 : index
    %c0_4 = arith.constant 0 : index
    %3 = vector.load %arg4[%c0_3, %c0_4] : memref<128x3xf32, #tpu.memory_space<vmem>>, vector<128x3xf32>
    %4 = vector.extract_strided_slice %3 {offsets = [0, 0], sizes = [128, 1], strides = [1, 1]} : vector<128x3xf32> to vector<128x1xf32>
    %5 = vector.broadcast %4 : vector<128x1xf32> to vector<128x256xf32>
    %6 = arith.addf %2, %5 : vector<128x256xf32>
    %cst_5 = arith.constant 0.000000e+00 : f32
    %7 = vector.broadcast %cst_5 : f32 to vector<128x256xf32>
    %8 = arith.maximumf %6, %7 : vector<128x256xf32>
    %c0_6 = arith.constant 0 : index
    %c0_7 = arith.constant 0 : index
    %9 = vector.load %arg3[%c0_6, %c0_7] : memref<128x128xf32, #tpu.memory_space<vmem>>, vector<128x128xf32>
    %cst_8 = arith.constant dense<0.000000e+00> : vector<128x256xf32>
    %10 = tpu.matmul %9, %8, %cst_8 {dimension_numbers = #tpu.dot_dimension_numbers<[1], [0], [0], [1], [0, 0, 1, 1], [], []>} : vector<128x128xf32>, vector<128x256xf32>, vector<128x256xf32> -> vector<128x256xf32>
    %11 = vector.extract_strided_slice %3 {offsets = [0, 1], sizes = [128, 1], strides = [1, 1]} : vector<128x3xf32> to vector<128x1xf32>
    %12 = vector.broadcast %11 : vector<128x1xf32> to vector<128x256xf32>
    %13 = arith.addf %10, %12 : vector<128x256xf32>
    %cst_9 = arith.constant 0.000000e+00 : f32
    %14 = vector.broadcast %cst_9 : f32 to vector<128x256xf32>
    %15 = arith.maximumf %13, %14 : vector<128x256xf32>
    %16 = vector.extract_strided_slice %3 {offsets = [0, 2], sizes = [128, 1], strides = [1, 1]} : vector<128x3xf32> to vector<128x1xf32>
    %17 = vector.broadcast %16 : vector<128x1xf32> to vector<128x256xf32>
    %18 = arith.mulf %15, %17 : vector<128x256xf32>
    %cst_10 = arith.constant dense<0.000000e+00> : vector<256xf32>
    %19 = vector.multi_reduction <add>, %18, %cst_10 [0] : vector<128x256xf32> to vector<256xf32>
    %20 = vector.shape_cast %19 : vector<256xf32> to vector<1x256xf32>
    %c0_11 = arith.constant 0 : index
    %c0_12 = arith.constant 0 : index
    %21 = memref.load %arg5[%c0_11, %c0_12] : memref<1x1xf32, #tpu.memory_space<smem>>
    %22 = vector.broadcast %21 : f32 to vector<1x256xf32>
    %23 = arith.addf %20, %22 : vector<1x256xf32>
    %c0_13 = arith.constant 0 : index
    %c0_14 = arith.constant 0 : index
    %24 = vector.load %arg6[%c0_13, %c0_14] : memref<1x256xf32, #tpu.memory_space<vmem>>, vector<1x256xf32>
    tpu.vector_store %arg6[%c0_13, %c0_14], %23 {strides = array<i32>} : memref<1x256xf32, #tpu.memory_space<vmem>>, vector<1x256xf32>,
    return
  }
  func.func @transform_0(%arg0: i32) -> (i32, i32) {
    %c0_i32 = arith.constant 0 : i32
    %c0_i32_0 = arith.constant 0 : i32
    return %arg0, %c0_i32 : i32, i32
  }
  func.func @transform_1(%arg0: i32) -> (i32, i32) {
    %c0_i32 = arith.constant 0 : i32
    %c0_i32_0 = arith.constant 0 : i32
    %c0_i32_1 = arith.constant 0 : i32
    return %c0_i32, %c0_i32_0 : i32, i32
  }
  func.func @transform_2(%arg0: i32) -> (i32, i32) {
    %c0_i32 = arith.constant 0 : i32
    %c0_i32_0 = arith.constant 0 : i32
    %c0_i32_1 = arith.constant 0 : i32
    return %c0_i32, %c0_i32_0 : i32, i32
  }
  func.func @transform_3(%arg0: i32) -> (i32, i32) {
    %c0_i32 = arith.constant 0 : i32
    %c0_i32_0 = arith.constant 0 : i32
    %c0_i32_1 = arith.constant 0 : i32
    return %c0_i32, %c0_i32_0 : i32, i32
  }
  func.func @transform_4(%arg0: i32) -> (i32, i32) {
    %c0_i32 = arith.constant 0 : i32
    %c0_i32_0 = arith.constant 0 : i32
    %c0_i32_1 = arith.constant 0 : i32
    return %c0_i32, %c0_i32_0 : i32, i32
  }
  func.func @transform_5(%arg0: i32) -> (i32, i32) {
    %c0_i32 = arith.constant 0 : i32
    %c0_i32_0 = arith.constant 0 : i32
    return %c0_i32, %arg0 : i32, i32
  }
}

module attributes {stable_mosaic.version = 11 : i64} {
  func.func @_mlp_kernel(%arg0: i32, %arg1: memref<256x128xf32, #tpu.memory_space<vmem>>, %arg2: memref<128x128xf32, #tpu.memory_space<vmem>>, %arg3: memref<128x128xf32, #tpu.memory_space<vmem>>, %arg4: memref<128x3xf32, #tpu.memory_space<vmem>>, %arg5: memref<1x1xf32, #tpu.memory_space<smem>>, %arg6: memref<1x256xf32, #tpu.memory_space<vmem>>) attributes {dimension_semantics = [#tpu.dimension_semantics<parallel>], iteration_bounds = array<i64: 1>, scalar_prefetch = 0 : i64, scratch_operands = 0 : i64, tpu.core_type = #tpu.core_type<tc>, window_params = [{transform_indices = @transform_0, window_bounds = array<i64: 256, 128>}, {pipeline_mode = #tpu.pipeline_mode<synchronous>, transform_indices = @transform_1, window_bounds = array<i64: 128, 128>}, {pipeline_mode = #tpu.pipeline_mode<synchronous>, transform_indices = @transform_2, window_bounds = array<i64: 128, 128>}, {pipeline_mode = #tpu.pipeline_mode<synchronous>, transform_indices = @transform_3, window_bounds = array<i64: 128, 3>}, {transform_indices = @transform_4, window_bounds = array<i64: 1, 1>}, {transform_indices = @transform_5, window_bounds = array<i64: 1, 256>}]} {
    %c0 = arith.constant 0 : index
    %c0_0 = arith.constant 0 : index
    %0 = vector.load %arg2[%c0, %c0_0] : memref<128x128xf32, #tpu.memory_space<vmem>>, vector<128x128xf32>
    %c0_1 = arith.constant 0 : index
    %c0_2 = arith.constant 0 : index
    %1 = vector.load %arg1[%c0_1, %c0_2] : memref<256x128xf32, #tpu.memory_space<vmem>>, vector<256x128xf32>
    %cst = arith.constant dense<0.000000e+00> : vector<128x256xf32>
    %2 = tpu.matmul %0, %1, %cst {dimension_numbers = #tpu.dot_dimension_numbers<[1], [1], [0], [0], [0, 0, 1, 0], [], []>} : vector<128x128xf32>, vector<256x128xf32>, vector<128x256xf32> -> vector<128x256xf32>
    %c0_3 = arith.constant 0 : index
    %c0_4 = arith.constant 0 : index
    %3 = vector.load %arg4[%c0_3, %c0_4] : memref<128x3xf32, #tpu.memory_space<vmem>>, vector<128x3xf32>
    %4 = vector.extract_strided_slice %3 {offsets = [0, 0], sizes = [128, 1], strides = [1, 1]} : vector<128x3xf32> to vector<128x1xf32>
    %5 = vector.broadcast %4 : vector<128x1xf32> to vector<128x256xf32>
    %6 = arith.addf %2, %5 : vector<128x256xf32>
    %cst_5 = arith.constant 0.000000e+00 : f32
    %7 = vector.broadcast %cst_5 : f32 to vector<128x256xf32>
    %8 = arith.maximumf %6, %7 : vector<128x256xf32>
    %c0_6 = arith.constant 0 : index
    %c0_7 = arith.constant 0 : index
    %9 = vector.load %arg3[%c0_6, %c0_7] : memref<128x128xf32, #tpu.memory_space<vmem>>, vector<128x128xf32>
    %cst_8 = arith.constant dense<0.000000e+00> : vector<128x256xf32>
    %10 = tpu.matmul %9, %8, %cst_8 {dimension_numbers = #tpu.dot_dimension_numbers<[1], [0], [0], [1], [0, 0, 1, 1], [], []>} : vector<128x128xf32>, vector<128x256xf32>, vector<128x256xf32> -> vector<128x256xf32>
    %11 = vector.extract_strided_slice %3 {offsets = [0, 1], sizes = [128, 1], strides = [1, 1]} : vector<128x3xf32> to vector<128x1xf32>
    %12 = vector.broadcast %11 : vector<128x1xf32> to vector<128x256xf32>
    %13 = arith.addf %10, %12 : vector<128x256xf32>
    %cst_9 = arith.constant 0.000000e+00 : f32
    %14 = vector.broadcast %cst_9 : f32 to vector<128x256xf32>
    %15 = arith.maximumf %13, %14 : vector<128x256xf32>
    %16 = vector.extract_strided_slice %3 {offsets = [0, 2], sizes = [128, 1], strides = [1, 1]} : vector<128x3xf32> to vector<128x1xf32>
    %17 = vector.broadcast %16 : vector<128x1xf32> to vector<128x256xf32>
    %18 = arith.mulf %15, %17 : vector<128x256xf32>
    %cst_10 = arith.constant dense<0.000000e+00> : vector<256xf32>
    %19 = vector.multi_reduction <add>, %18, %cst_10 [0] : vector<128x256xf32> to vector<256xf32>
    %20 = vector.shape_cast %19 : vector<256xf32> to vector<1x256xf32>
    %c0_11 = arith.constant 0 : index
    %c0_12 = arith.constant 0 : index
    %21 = memref.load %arg5[%c0_11, %c0_12] : memref<1x1xf32, #tpu.memory_space<smem>>
    %22 = vector.broadcast %21 : f32 to vector<1x256xf32>
    %23 = arith.addf %20, %22 : vector<1x256xf32>
    %c0_13 = arith.constant 0 : index
    %c0_14 = arith.constant 0 : index
    %24 = vector.load %arg6[%c0_13, %c0_14] : memref<1x256xf32, #tpu.memory_space<vmem>>, vector<1x256xf32>
    tpu.vector_store %arg6[%c0_13, %c0_14], %23 {strides = array<i32>} : memref<1x256xf32, #tpu.memory_space<vmem>>, vector<1x256xf32>,
    return
  }
  func.func @transform_0(%arg0: i32) -> (i32, i32) {
    %c0_i32 = arith.constant 0 : i32
    %c0_i32_0 = arith.constant 0 : i32
    return %arg0, %c0_i32 : i32, i32
  }
  func.func @transform_1(%arg0: i32) -> (i32, i32) {
    %c0_i32 = arith.constant 0 : i32
    %c0_i32_0 = arith.constant 0 : i32
    %c0_i32_1 = arith.constant 0 : i32
    return %c0_i32, %c0_i32_0 : i32, i32
  }
  func.func @transform_2(%arg0: i32) -> (i32, i32) {
    %c0_i32 = arith.constant 0 : i32
    %c0_i32_0 = arith.constant 0 : i32
    %c0_i32_1 = arith.constant 0 : i32
    return %c0_i32, %c0_i32_0 : i32, i32
  }
  func.func @transform_3(%arg0: i32) -> (i32, i32) {
    %c0_i32 = arith.constant 0 : i32
    %c0_i32_0 = arith.constant 0 : i32
    %c0_i32_1 = arith.constant 0 : i32
    return %c0_i32, %c0_i32_0 : i32, i32
  }
  func.func @transform_4(%arg0: i32) -> (i32, i32) {
    %c0_i32 = arith.constant 0 : i32
    %c0_i32_0 = arith.constant 0 : i32
    %c0_i32_1 = arith.constant 0 : i32
    return %c0_i32, %c0_i32_0 : i32, i32
  }
  func.func @transform_5(%arg0: i32) -> (i32, i32) {
    %c0_i32 = arith.constant 0 : i32
    %c0_i32_0 = arith.constant 0 : i32
    return %c0_i32, %arg0 : i32, i32
  }
}

</mosaic_0001>

<bundles_post_ra>
// kernel: tpu_custom_call.1
= control target key start
LH: loop header
LB: loop body
LE: loop exit
PB: predicated region body
PF: predicated region fallthrough
CT: control target
= control target key end

     0   :  { %11 = vsyncpa [#allocation4], 0  ;;  %s1381_s0 = inlined_call_operand.hbm [shape: f32[256,128], index: 0, kind: input, shape index: {}]   ;;  %s1382_s1 = inlined_call_operand.vmem [shape: f32[128,128], index: 1, kind: input, shape index: {}]   ;;  %s1383_s2 = inlined_call_operand.hbm [shape: f32[128,128], index: 2, kind: input, shape index: {}]   ;;  %s1384_s3 = inlined_call_operand.vmem [shape: f32[128,3], index: 3, kind: input, shape index: {}]   ;;  %s1385_s4 = inlined_call_operand.<no memory space> [shape: f32[1,1], index: 4, kind: input, shape index: {}]   ;;  %s1386_s5 = inlined_call_operand.hbm [shape: f32[1,256], index: 5, kind: output, shape index: {}]  }
   0x1   :  { %12 = vsyncpa [#allocation7], 0 }
   0x2   :  { %13 = vsyncpa [#allocation5], 0  ;;  %s998_s18 = smov [#allocation3]  }
   0x3   :  { %s19_s19 = sshll.u32 %s998_s18, 4  ;;  %s20_s19 = int_to_ptr.vmem [resolvable:$true] %s19_s19 }
   0x4   :  { %s940_s20 = scalar_lea.vmem %s20_s19, 4096  ;;  %p945_p1 = scmp.lt.s32.totalorder %s20_s19, %s20_s19 }
   0x5   :  { %p941_p0 = scmp.ne.s32.totalorder %s20_s19, %s940_s20  ;;  %p946_p2 = scmp.lt.s32.totalorder %s940_s20, %s940_s20 }
   0x7   :  { %p947_p3 = por %p946_p2, %p945_p1 }
   0x9   :  { %p948_p4 = pnand %p947_p3, %p941_p0 }
   0xb   :  { %951 = shalt.err (!%p948_p4)
}
   0xc   :  { %s999_s21 = smov 128   ;;  %s1000_s22 = smov 8  }
   0xd   :  { %25 = dma.hbm_to_vmem [thread:$0]  %s1381_s0, 4096, %s20_s19, [#allocation4], %s999_s21, %s999_s21, %s1000_s22  }
   0xe   :  { %s1001_s25 = smov [#allocation6]  }
   0xf   :  { %s33_s26 = sshll.u32 %s1001_s25, 4  ;;  %s34_s26 = int_to_ptr.vmem [resolvable:$true] %s33_s26 }
  0x10   :  { %s960_s27 = scalar_lea.vmem %s34_s26, 2048  ;;  %p965_p6 = scmp.lt.s32.totalorder %s34_s26, %s34_s26 }
  0x11   :  { %p961_p5 = scmp.ne.s32.totalorder %s34_s26, %s960_s27  ;;  %p966_p7 = scmp.lt.s32.totalorder %s960_s27, %s960_s27 }
  0x13   :  { %p967_p8 = por %p966_p7, %p965_p6 }
  0x15   :  { %p968_p9 = pnand %p967_p8, %p961_p5 }
  0x17   :  { %971 = shalt.err (!%p968_p9)
}
  0x18   :  { %39 = dma.hbm_to_vmem [thread:$0]  %s1383_s2, 2048, %s34_s26, [#allocation7], %s999_s21, %s999_s21, %s1000_s22  }
  0x19   :  { %992 = dma.done.wait [#allocation4], 4096  }
  0x1a   :  { %993 = vsyncadd [#allocation4], 4294963200 }
  0x1b   :  { %994 = dma.done.wait [#allocation7], 2048  }
  0x1c   :  { %995 = vsyncadd [#allocation7], 4294965248  ;;  %v1002_v0 = vmov 0   ;;  %v97_v1 = vld [vmem:[#allocation3 + $0xf8] sm:$0xff]  ;;  %v96_v3 = vld [vmem:[#allocation3 + $0xf0] sm:$0xff]  ;;  %s1007_s12 = smov [#allocation8]  }
  0x1d   :  { %916 = vset.pattern.permute.xlu1 %v1002_v0  ;;  %915 = vset.pattern.permute.xlu0 %v1002_v0  ;;  %v81_v2 = vld [vmem:[#allocation3 + $0x78] sm:$0xff]  ;;  %v80_v4 = vld [vmem:[#allocation3 + $0x70] sm:$0xff]  ;;  %v95_v5 = vld [vmem:[#allocation3 + $0xe8] sm:$0xff]  ;;  %s831_s13 = sshll.u32 %s1007_s12, 4  ;;  %s832_s13 = int_to_ptr.vmem [resolvable:$true] %s831_s13 }
  0x1e   :  { %841 = vmatprep.subr.mxu0 %v97_v1  ;;  %v79_v6 = vld [vmem:[#allocation3 + $0x68] sm:$0xff]  ;;  %v94_v7 = vld [vmem:[#allocation3 + $0xe0] sm:$0xff]  ;;  %v93_v10 = vld [vmem:[#allocation3 + $0xd8] sm:$0xff]  ;;  %v1003_v1 = vmov 0.0   ;;  %s972_s14 = scalar_lea.vmem %s832_s13, 32  ;;  %p977_p11 = scmp.lt.s32.totalorder %s832_s13, %s832_s13 }
  0x1f   :  { %842 = vmatpush3.xpose.msra.mxu0 %v81_v2  ;;  %v1047_v8 = vld [vmem:[%s1382_s1] sm:$0xff]  ;;  %v1053_v11 = vld [vmem:[%s1384_s3 + $0x68] sm:$0xff]  ;;  %v77_v12 = vld [vmem:[#allocation3 + $0x58] sm:$0xff]  ;;  %531 = vmatprep.mubr.f32.mxu1 %v1003_v1  ;;  %p973_p10 = scmp.ne.s32.totalorder %s832_s13, %s972_s14  ;;  %p978_p12 = scmp.lt.s32.totalorder %s972_s14, %s972_s14 }
  0x20   :  { %843 = vmatprep.subr.mxu0 %v96_v3  ;;  %v78_v9 = vld [vmem:[#allocation3 + $0x60] sm:$0xff]  ;;  %873 = vmatprep.mubr.f32.mxu0 %v1047_v8  ;;  %v1059_v13 = vld [vmem:[%s1384_s3 + $0x78] sm:$0xff]  ;;  %v92_v14 = vld [vmem:[#allocation3 + $0xd0] sm:$0xff] }
  0x21   :  { %181 = vperm.xlu1 %916, %v1053_v11   ;;  %191 = vperm.xlu0 %915, %v1059_v13   ;;  %v1065_v15 = vld [vmem:[%s1384_s3 + $0x60] sm:$0xff]  ;;  %v1070_v16 = vld [vmem:[%s1384_s3 + $0x70] sm:$0xff]  ;;  %v91_v18 = vld [vmem:[#allocation3 + $0xc8] sm:$0xff]  ;;  %p979_p13 = por %p978_p12, %p977_p11 }
  0x22   :  { %v76_v17 = vld [vmem:[#allocation3 + $0x50] sm:$0xff]  ;;  %v1082_v20 = vld [vmem:[%s1384_s3 + $0x58] sm:$0xff]  ;;  %v75_v21 = vld [vmem:[#allocation3 + $0x48] sm:$0xff] }
  0x23   :  { %844 = vmatpush3.xpose.msra.mxu0 %v80_v4  ;;  %v1077_v19 = vld [vmem:[%s1384_s3 + $0x50] sm:$0xff]  ;;  %v90_v22 = vld [vmem:[#allocation3 + $0xc0] sm:$0xff]  ;;  %v1094_v24 = vld [vmem:[%s1384_s3 + $0x48] sm:$0xff]  ;;  %p980_p0 = pnand %p979_p13, %p973_p10 }
  0x24   :  { %845 = vmatprep.subr.mxu0 %v95_v5  ;;  %v1089_v23 = vld [vmem:[%s1384_s3 + $0x40] sm:$0xff]  ;;  %v89_v26 = vld [vmem:[#allocation3 + $0xb8] sm:$0xff]  ;;  %v1101_v27 = vld [vmem:[%s1384_s3 + $0x30] sm:$0xff] }
  0x25   :  { %176 = vperm.xlu1 %916, %v1065_v15   ;;  %186 = vperm.xlu0 %915, %v1070_v16   ;;  %v74_v25 = vld [vmem:[#allocation3 + $0x40] sm:$0xff]  ;;  %v1106_v28 = vld [vmem:[%s1384_s3 + $0x38] sm:$0xff]  ;;  %v88_v30 = vld [vmem:[#allocation3 + $0xb0] sm:$0xff] }
  0x26   :  { %v73_v29 = vld [vmem:[#allocation3 + $0x38] sm:$0xff]  ;;  %v1113_v31 = vld [vmem:[%s1384_s3 + $0x20] sm:$0xff]  ;;  %v1118_v32 = vld [vmem:[%s1384_s3 + $0x28] sm:$0xff] }
  0x27   :  { %846 = vmatpush3.xpose.msra.mxu0 %v79_v6  ;;  %v72_v33 = vld [vmem:[#allocation3 + $0x30] sm:$0xff]  ;;  %v87_v34 = vld [vmem:[#allocation3 + $0xa8] sm:$0xff]  ;;  %v1130_v36 = vld [vmem:[%s1384_s3 + $0x18] sm:$0xff] }
  0x28   :  { %847 = vmatprep.subr.mxu0 %v94_v7  ;;  %v1125_v35 = vld [vmem:[%s1384_s3 + $0x10] sm:$0xff]  ;;  %v71_v37 = vld [vmem:[#allocation3 + $0x28] sm:$0xff]  ;;  %v86_v38 = vld [vmem:[#allocation3 + $0xa0] sm:$0xff]  ;;  %v1004_v7 = vmov 1  }
  0x29   :  { %166 = vperm.xlu1 %916, %v1077_v19   ;;  %171 = vperm.xlu0 %915, %v1082_v20   ;;  %v1137_v39 = vld [vmem:[%s1384_s3] sm:$0xff]  ;;  %v1142_v40 = vld [vmem:[%s1384_s3 + $0x8] sm:$0xff]  ;;  %v85_v42 = vld [vmem:[#allocation3 + $0x98] sm:$0xff] }
  0x2a   :  { %v70_v41 = vld [vmem:[#allocation3 + $0x20] sm:$0xff]  ;;  %v69_v43 = vld [vmem:[#allocation3 + $0x18] sm:$0xff]  ;;  %v84_v44 = vld [vmem:[#allocation3 + $0x90] sm:$0xff] }
  0x2b   :  { %848 = vmatpush3.xpose.msra.mxu0 %v78_v9  ;;  %v68_v45 = vld [vmem:[#allocation3 + $0x10] sm:$0xff]  ;;  %v83_v46 = vld [vmem:[#allocation3 + $0x88] sm:$0xff]  ;;  %v82_v48 = vld [vmem:[#allocation3 + $0x80] sm:$0xff] }
  0x2c   :  { %849 = vmatprep.subr.mxu0 %v93_v10  ;;  %v67_v47 = vld [vmem:[#allocation3 + $0x8] sm:$0xff]  ;;  %v66_v49 = vld [vmem:[#allocation3] sm:$0xff]  ;;  %v52_v51 = vld [vmem:[%s1382_s1 + $0x10] sm:$0xff] }
  0x2d   :  { %156 = vperm.xlu1 %916, %v1089_v23   ;;  %161 = vperm.xlu0 %915, %v1094_v24   ;;  %v51_v50 = vld [vmem:[%s1382_s1 + $0x8] sm:$0xff]  ;;  %v53_v52 = vld [vmem:[%s1382_s1 + $0x18] sm:$0xff]  ;;  %v54_v53 = vld [vmem:[%s1382_s1 + $0x20] sm:$0xff] }
  0x2e   :  { %v55_v54 = vld [vmem:[%s1382_s1 + $0x28] sm:$0xff]  ;;  %v56_v55 = vld [vmem:[%s1382_s1 + $0x30] sm:$0xff]  ;;  %v57_v56 = vld [vmem:[%s1382_s1 + $0x38] sm:$0xff] }
  0x2f   :  { %850 = vmatpush3.xpose.msra.mxu0 %v77_v12  ;;  %v58_v57 = vld [vmem:[%s1382_s1 + $0x40] sm:$0xff]  ;;  %v59_v58 = vld [vmem:[%s1382_s1 + $0x48] sm:$0xff]  ;;  %v60_v59 = vld [vmem:[%s1382_s1 + $0x50] sm:$0xff] }
  0x30   :  { %851 = vmatprep.subr.mxu0 %v92_v14  ;;  %v61_v60 = vld [vmem:[%s1382_s1 + $0x58] sm:$0xff]  ;;  %v62_v61 = vld [vmem:[%s1382_s1 + $0x60] sm:$0xff]  ;;  %v63_v62 = vld [vmem:[%s1382_s1 + $0x68] sm:$0xff]  ;;  %v1005_v14 = vmov 2  }
  0x31   :  { %146 = vperm.xlu1 %916, %v1101_v27   ;;  %151 = vperm.xlu0 %915, %v1106_v28   ;;  %v64_v63 = vld [vmem:[%s1382_s1 + $0x70] sm:$0xff]  ;;  %v65_v0 = vld [vmem:[%s1382_s1 + $0x78] sm:$0xff] }
  0x33   :  { %852 = vmatpush3.xpose.msra.mxu0 %v76_v17 }
  0x34   :  { %853 = vmatprep.subr.mxu0 %v91_v18 }
  0x35   :  { %136 = vperm.xlu1 %916, %v1113_v31   ;;  %141 = vperm.xlu0 %915, %v1118_v32  }
  0x37   :  { %854 = vmatpush3.xpose.msra.mxu0 %v75_v21 }
  0x38   :  { %855 = vmatprep.subr.mxu0 %v90_v22 }
  0x39   :  { %126 = vperm.xlu1 %916, %v1125_v35   ;;  %131 = vperm.xlu0 %915, %v1130_v36  }
  0x3b   :  { %856 = vmatpush3.xpose.msra.mxu0 %v74_v25 }
  0x3c   :  { %857 = vmatprep.subr.mxu0 %v89_v26 }
  0x3d   :  { %116 = vperm.xlu1 %916, %v1137_v39   ;;  %121 = vperm.xlu0 %915, %v1142_v40  }
  0x3f   :  { %858 = vmatpush3.xpose.msra.mxu0 %v73_v29 }
  0x40   :  { %859 = vmatprep.subr.mxu0 %v88_v30 }
  0x41   :  { %917 = vset.pattern.permute.xlu1 %v1004_v7  ;;  %919 = vset.pattern.permute.xlu0 %v1005_v14 }
  0x42   :  { %408 = vperm.xlu1 %917, %v1142_v40   ;;  %665 = vperm.xlu0 %919, %v1142_v40  }
  0x43   :  { %860 = vmatpush3.xpose.msra.mxu0 %v72_v33 }
  0x44   :  { %861 = vmatprep.subr.mxu0 %v87_v34 }
  0x46   :  { %412 = vperm.xlu1 %917, %v1125_v35   ;;  %677 = vperm.xlu0 %919, %v1113_v31  }
  0x47   :  { %862 = vmatpush3.xpose.msra.mxu0 %v71_v37 }
  0x48   :  { %863 = vmatprep.subr.mxu0 %v86_v38 }
  0x4a   :  { %918 = vset.pattern.permute.xlu1 %v1005_v14  ;;  %689 = vperm.xlu0 %919, %v1106_v28  }
  0x4b   :  { %864 = vmatpush3.xpose.msra.mxu0 %v70_v41  ;;  %661 = vperm.xlu1 %918, %v1137_v39  }
  0x4c   :  { %865 = vmatprep.subr.mxu0 %v85_v42 }
  0x4e   :  { %701 = vperm.xlu0 %919, %v1077_v19  }
  0x4f   :  { %866 = vmatpush3.xpose.msra.mxu0 %v69_v43  ;;  %920 = vset.pattern.permute.xlu1 %v1004_v7 }
  0x50   :  { %867 = vmatprep.subr.mxu0 %v84_v44  ;;  %420 = vperm.xlu1 %920, %v1113_v31  }
  0x52   :  { %927 = vset.pattern.permute.xlu0 %v1004_v7 }
  0x53   :  { %868 = vmatpush3.xpose.msra.mxu0 %v68_v45  ;;  %404 = vperm.xlu0 %927, %v1137_v39  }
  0x54   :  { %869 = vmatprep.subr.mxu0 %v83_v46  ;;  %921 = vset.pattern.permute.xlu1 %v1005_v14 }
  0x55   :  { %669 = vperm.xlu1 %921, %v1125_v35  }
  0x57   :  { %870 = vmatpush3.xpose.msra.mxu0 %v67_v47  ;;  %416 = vperm.xlu0 %927, %v1130_v36  }
  0x58   :  { %871 = vmatprep.subr.mxu0 %v82_v48 }
  0x59   :  { %673 = vperm.xlu1 %921, %v1130_v36  }
  0x5b   :  { %872 = vmatpush3.xpose.msra.mxu0 %v66_v49  ;;  %424 = vperm.xlu0 %927, %v1118_v32  }
  0x5d   :  { %922 = vset.pattern.permute.xlu1 %v1004_v7 }
  0x5e   :  { %874 = vmatmul.mubr.f32.vlgmr.msra.gmra.mxu0 %v1047_v8  ;;  %428 = vperm.xlu1 %922, %v1101_v27  }
  0x5f   :  { %875 = vmatprep.mubr.f32.mxu0 %v51_v50  ;;  %436 = vperm.xlu0 %927, %v1089_v23  }
  0x62   :  { %876 = vmatmul.mubr.f32.gmra.mxu0 %v51_v50  ;;  %432 = vperm.xlu1 %922, %v1106_v28  }
  0x63   :  { %877 = vmatprep.mubr.f32.mxu0 %v52_v51  ;;  %448 = vperm.xlu0 %927, %v1082_v20  }
  0x66   :  { %878 = vmatmul.mubr.f32.gmra.mxu0 %v52_v51  ;;  %923 = vset.pattern.permute.xlu1 %v1005_v14 }
  0x67   :  { %879 = vmatprep.mubr.f32.mxu0 %v53_v52  ;;  %681 = vperm.xlu1 %923, %v1118_v32  }
  0x68   :  { %460 = vperm.xlu0 %927, %v1070_v16  }
  0x6a   :  { %880 = vmatmul.mubr.f32.gmra.mxu0 %v53_v52 }
  0x6b   :  { %881 = vmatprep.mubr.f32.mxu0 %v54_v53  ;;  %685 = vperm.xlu1 %923, %v1101_v27  }
  0x6c   :  { %930 = vset.pattern.permute.xlu0 %v1005_v14 }
  0x6d   :  { %713 = vperm.xlu0 %930, %v1053_v11  }
  0x6e   :  { %882 = vmatmul.mubr.f32.gmra.mxu0 %v54_v53 }
  0x6f   :  { %883 = vmatprep.mubr.f32.mxu0 %v55_v54  ;;  %924 = vset.pattern.permute.xlu1 %v1004_v7 }
  0x70   :  { %440 = vperm.xlu1 %924, %v1094_v24  }
  0x72   :  { %884 = vmatmul.mubr.f32.gmra.mxu0 %v55_v54 }
  0x73   :  { %885 = vmatprep.mubr.f32.mxu0 %v56_v55 }
  0x74   :  { %444 = vperm.xlu1 %924, %v1077_v19  }
  0x76   :  { %886 = vmatmul.mubr.f32.gmra.mxu0 %v56_v55 }
  0x77   :  { %887 = vmatprep.mubr.f32.mxu0 %v57_v56 }
  0x78   :  { %925 = vset.pattern.permute.xlu1 %v1005_v14 }
  0x79   :  { %693 = vperm.xlu1 %925, %v1089_v23  }
  0x7a   :  { %888 = vmatmul.mubr.f32.gmra.mxu0 %v57_v56 }
  0x7b   :  { %889 = vmatprep.mubr.f32.mxu0 %v58_v57 }
  0x7d   :  { %697 = vperm.xlu1 %925, %v1094_v24  }
  0x7e   :  { %890 = vmatmul.mubr.f32.gmra.mxu0 %v58_v57 }
  0x7f   :  { %891 = vmatprep.mubr.f32.mxu0 %v59_v58 }
  0x81   :  { %926 = vset.pattern.permute.xlu1 %v1004_v7 }
  0x82   :  { %892 = vmatmul.mubr.f32.gmra.mxu0 %v59_v58  ;;  %452 = vperm.xlu1 %926, %v1065_v15  }
  0x83   :  { %893 = vmatprep.mubr.f32.mxu0 %v60_v59 }
  0x86   :  { %894 = vmatmul.mubr.f32.gmra.mxu0 %v60_v59  ;;  %456 = vperm.xlu1 %926, %v1053_v11  }
  0x87   :  { %895 = vmatprep.mubr.f32.mxu0 %v61_v60 }
  0x8a   :  { %896 = vmatmul.mubr.f32.gmra.mxu0 %v61_v60  ;;  %928 = vset.pattern.permute.xlu1 %v1005_v14 }
  0x8b   :  { %897 = vmatprep.mubr.f32.mxu0 %v62_v61  ;;  %705 = vperm.xlu1 %928, %v1082_v20  }
  0x8e   :  { %898 = vmatmul.mubr.f32.gmra.mxu0 %v62_v61 }
  0x8f   :  { %899 = vmatprep.mubr.f32.mxu0 %v63_v62  ;;  %709 = vperm.xlu1 %928, %v1065_v15  }
  0x92   :  { %900 = vmatmul.mubr.f32.gmra.mxu0 %v63_v62 }
  0x93   :  { %901 = vmatprep.mubr.f32.mxu0 %v64_v63  ;;  %929 = vset.pattern.permute.xlu1 %v1004_v7  ;;  %v387_v7 = vld [vmem:[#allocation6] sm:$0xff] }
  0x94   :  { %464 = vperm.xlu1 %929, %v1059_v13  }
  0x96   :  { %902 = vmatmul.mubr.f32.gmra.mxu0 %v64_v63 }
  0x97   :  { %903 = vmatprep.mubr.f32.mxu0 %v65_v0 }
  0x98   :  { %931 = vset.pattern.permute.xlu1 %v1005_v14  ;;  %v390_v14 = vld [vmem:[#allocation6 + $0x18] sm:$0xff] }
  0x99   :  { %717 = vperm.xlu1 %931, %v1070_v16   ;;  %v391_v16 = vld [vmem:[#allocation6 + $0x20] sm:$0xff] }
  0x9a   :  { %904 = vmatmul.mubr.f32.gmra.mxu0 %v65_v0 }
  0x9c   :  { %v192_v40 = vpop.permute.xlu0 %191  ;;  %v182_v41 = vpop.permute.xlu1 %181 }
  0x9d   :  { %721 = vperm.xlu1 %931, %v1059_v13   ;;  %v393_v13 = vld [vmem:[#allocation6 + $0x30] sm:$0xff] }
  0xa0   :  { %v187_v36 = vpop.permute.xlu0 %186  ;;  %v177_v44 = vpop.permute.xlu1 %176 }
  0xa4   :  { %v172_v46 = vpop.permute.xlu0 %171  ;;  %v167_v48 = vpop.permute.xlu1 %166 }
  0xa8   :  { %v162_v51 = vpop.permute.xlu0 %161  ;;  %v157_v55 = vpop.permute.xlu1 %156 }
  0xac   :  { %v152_v63 = vpop.permute.xlu0 %151  ;;  %v147_v23 = vpop.permute.xlu1 %146 }
 0x11e   :  { %v1193_v2 = vpop.f32.mrf.mxu0 }
 0x120   :  { %v1195_v3 = vpop.f32.mrf.mxu0 }
 0x122   :  { %v1197_v4 = vpop.f32.mrf.mxu0 }
 0x124   :  { %v1199_v5 = vpop.f32.mrf.mxu0 }
 0x126   :  { %v1201_v6 = vpop.f32.mrf.mxu0 }
 0x128   :  { %v1205_v8 = vpop.f32.mrf.mxu0 }
 0x12a   :  { %v1207_v9 = vpop.f32.mrf.mxu0 }
 0x12c   :  { %v1210_v10 = vpop.f32.mrf.mxu0 }
 0x12e   :  { %v1212_v12 = vpop.f32.mrf.mxu0 }
 0x130   :  { %v1216_v17 = vpop.f32.mrf.mxu0 }
 0x132   :  { %v1220_v18 = vpop.f32.mrf.mxu0 }
 0x134   :  { %v1222_v21 = vpop.f32.mrf.mxu0 }
 0x136   :  { %v1227_v22 = vpop.f32.mrf.mxu0 }
 0x138   :  { %v1229_v25 = vpop.f32.mrf.mxu0 }
 0x13a   :  { %v1233_v26 = vpop.f32.mrf.mxu0 }
 0x13c   :  { %v1236_v29 = vpop.f32.mrf.mxu0 }
 0x13e   :  { %v1239_v30 = vpop.f32.mrf.mxu0 }
 0x140   :  { %v1242_v31 = vpop.f32.mrf.mxu0 }
 0x142   :  { %v1246_v33 = vpop.f32.mrf.mxu0 }
 0x143   :  { %v315_v24 = vadd.f32 %v1246_v33, %v162_v51  ;;  %v303_v33 = vadd.f32 %v1233_v26, %v152_v63 }
 0x144   :  { %v1250_v34 = vpop.f32.mrf.mxu0 }
 0x145   :  { %v369_v26 = vmax.f32 %v303_v33, 0.0 }
 0x146   :  { %v320_v35 = vpop.f32.mrf.mxu0 }
 0x148   :  { %v322_v37 = vpop.f32.mrf.mxu0 }
 0x14a   :  { %v326_v38 = vpop.f32.mrf.mxu0 }
 0x14c   :  { %v328_v39 = vpop.f32.mrf.mxu0 }
 0x14d   :  { %v329_v0 = vadd.f32 %v328_v39, %v172_v46  ;;  %v142_v39 = vpop.permute.xlu0 %141 }
 0x14e   :  { %v332_v42 = vpop.f32.mrf.mxu0  ;;  %v291_v11 = vadd.f32 %v1220_v18, %v142_v39 }
 0x14f   :  { %v333_v61 = vadd.f32 %v332_v42, %v177_v44  ;;  %v317_v42 = vadd.f32 %v1250_v34, %v162_v51  ;;  %v305_v34 = vadd.f32 %v1236_v29, %v152_v63  ;;  %v297_v51 = vadd.f32 %v1227_v22, %v147_v23 }
 0x150   :  { %v334_v43 = vpop.f32.mrf.mxu0  ;;  %v365_v18 = vmax.f32 %v291_v11, 0.0 }
 0x151   :  { %v335_v59 = vadd.f32 %v334_v43, %v177_v44  ;;  %v379_v43 = vmax.f32 %v333_v61, 0.0  ;;  %v370_v29 = vmax.f32 %v305_v34, 0.0 }
 0x152   :  { %v338_v28 = vpop.f32.mrf.mxu0 }
 0x153   :  { %v339_v58 = vadd.f32 %v338_v28, %v182_v41  ;;  %v378_v28 = vmax.f32 %v329_v0, 0.0 }
 0x154   :  { %v340_v45 = vpop.f32.mrf.mxu0 }
 0x155   :  { %v341_v56 = vadd.f32 %v340_v45, %v182_v41  ;;  %v323_v45 = vadd.f32 %v322_v37, %v167_v48  ;;  %v321_v41 = vadd.f32 %v320_v35, %v167_v48  ;;  %v311_v37 = vadd.f32 %v1242_v31, %v157_v55  ;;  %v137_v48 = vpop.permute.xlu1 %136 }
 0x156   :  { %v344_v32 = vpop.f32.mrf.mxu0  ;;  %v309_v35 = vadd.f32 %v1239_v30, %v157_v55  ;;  %v285_v22 = vadd.f32 %v1212_v12, %v137_v48 }
 0x157   :  { %v345_v54 = vadd.f32 %v344_v32, %v187_v36  ;;  %v381_v32 = vmax.f32 %v339_v58, 0.0  ;;  %v376_v44 = vmax.f32 %v323_v45, 0.0  ;;  %v372_v31 = vmax.f32 %v311_v37, 0.0  ;;  %v396_v45 = vld [vmem:[#allocation6 + $0x48] sm:$0xff] }
 0x158   :  { %v346_v47 = vpop.f32.mrf.mxu0  ;;  %v371_v30 = vmax.f32 %v309_v35, 0.0  ;;  %v363_v12 = vmax.f32 %v285_v22, 0.0 }
 0x159   :  { %v347_v52 = vadd.f32 %v346_v47, %v187_v36  ;;  %v383_v62 = vmax.f32 %v345_v54, 0.0  ;;  %v327_v36 = vadd.f32 %v326_v38, %v172_v46  ;;  %v380_v47 = vmax.f32 %v335_v59, 0.0 }
 0x15a   :  { %v350_v27 = vpop.f32.mrf.mxu0  ;;  %v375_v46 = vmax.f32 %v321_v41, 0.0  ;;  %v287_v54 = vadd.f32 %v1216_v17, %v137_v48  ;;  %v398_v41 = vld [vmem:[#allocation6 + $0x58] sm:$0xff] }
 0x15b   :  { %v351_v49 = vadd.f32 %v350_v27, %v192_v40  ;;  %v384_v60 = vmax.f32 %v347_v52, 0.0  ;;  %v377_v38 = vmax.f32 %v327_v36, 0.0  ;;  %v374_v27 = vmax.f32 %v317_v42, 0.0  ;;  %v132_v52 = vpop.permute.xlu0 %131  ;;  %v392_v36 = vld [vmem:[#allocation6 + $0x28] sm:$0xff] }
 0x15c   :  { %v352_v50 = vpop.f32.mrf.mxu0  ;;  %v279_v58 = vadd.f32 %v1207_v9, %v132_v52  ;;  %v364_v17 = vmax.f32 %v287_v54, 0.0  ;;  %v400_v42 = vld [vmem:[#allocation6 + $0x68] sm:$0xff] }
 0x15d   :  { %v353_v53 = vadd.f32 %v352_v50, %v192_v40  ;;  %v385_v19 = vmax.f32 %v351_v49, 0.0  ;;  %v382_v40 = vmax.f32 %v341_v56, 0.0  ;;  %v373_v49 = vmax.f32 %v315_v24, 0.0  ;;  %v402_v24 = vld [vmem:[#allocation6 + $0x78] sm:$0xff] }
 0x15e   :  { %v299_v50 = vadd.f32 %v1229_v25, %v147_v23  ;;  %v127_v25 = vpop.permute.xlu1 %126  ;;  %v367_v56 = vmax.f32 %v297_v51, 0.0  ;;  %v395_v23 = vld [vmem:[#allocation6 + $0x40] sm:$0xff] }
 0x15f   :  { %v386_v57 = vmax.f32 %v353_v53, 0.0  ;;  %v293_v53 = vadd.f32 %v1222_v21, %v142_v39  ;;  %v281_v21 = vadd.f32 %v1210_v10, %v132_v52  ;;  %v122_v20 = vpop.permute.xlu0 %121  ;;  %v273_v59 = vadd.f32 %v1201_v6, %v127_v25 }
 0x160   :  { %v368_v55 = vmax.f32 %v299_v50, 0.0  ;;  %v269_v10 = vadd.f32 %v1199_v5, %v122_v20  ;;  %v267_v9 = vadd.f32 %v1197_v4, %v122_v20 }
 0x161   :  { %467 = vmatprep.subr.mxu1 %v386_v57  ;;  %v366_v57 = vmax.f32 %v293_v53, 0.0  ;;  %v362_v61 = vmax.f32 %v281_v21, 0.0  ;;  %v359_v63 = vmax.f32 %v273_v59, 0.0 }
 0x162   :  { %468 = vmatpush1.msra.mxu1 %v385_v19  ;;  %v275_v19 = vadd.f32 %v1205_v8, %v127_v25  ;;  %v358_v0 = vmax.f32 %v269_v10, 0.0  ;;  %v357_v5 = vmax.f32 %v267_v9, 0.0 }
 0x163   :  { %469 = vmatprep.subr.mxu1 %v384_v60  ;;  %v117_v60 = vpop.permute.xlu1 %116  ;;  %v666_v33 = vpop.permute.xlu0 %665 }
 0x164   :  { %470 = vmatpush1.msra.mxu1 %v383_v62  ;;  %v361_v62 = vmax.f32 %v279_v58, 0.0  ;;  %v263_v15 = vadd.f32 %v1195_v3, %v117_v60  ;;  %v360_v8 = vmax.f32 %v275_v19, 0.0  ;;  %v261_v6 = vadd.f32 %v1193_v2, %v117_v60  ;;  %v388_v2 = vld [vmem:[#allocation6 + $0x8] sm:$0xff]  ;;  %v389_v3 = vld [vmem:[#allocation6 + $0x10] sm:$0xff] }
 0x165   :  { %471 = vmatprep.subr.mxu1 %v382_v40 }
 0x166   :  { %472 = vmatpush1.msra.mxu1 %v381_v32  ;;  %v356_v40 = vmax.f32 %v263_v15, 0.0  ;;  %v355_v4 = vmax.f32 %v261_v6, 0.0  ;;  %v394_v32 = vld [vmem:[#allocation6 + $0x38] sm:$0xff] }
 0x167   :  { %473 = vmatprep.subr.mxu1 %v380_v47  ;;  %v397_v47 = vld [vmem:[#allocation6 + $0x50] sm:$0xff] }
 0x168   :  { %474 = vmatpush1.msra.mxu1 %v379_v43  ;;  %v399_v43 = vld [vmem:[#allocation6 + $0x60] sm:$0xff] }
 0x169   :  { %475 = vmatprep.subr.mxu1 %v378_v28  ;;  %v401_v28 = vld [vmem:[#allocation6 + $0x70] sm:$0xff] }
 0x16a   :  { %476 = vmatpush1.msra.mxu1 %v377_v38  ;;  %v409_v38 = vpop.permute.xlu1 %408 }
 0x16b   :  { %477 = vmatprep.subr.mxu1 %v376_v44 }
 0x16c   :  { %478 = vmatpush1.msra.mxu1 %v375_v46 }
 0x16d   :  { %479 = vmatprep.subr.mxu1 %v374_v27 }
 0x16e   :  { %480 = vmatpush1.msra.mxu1 %v373_v49  ;;  %v413_v39 = vpop.permute.xlu1 %412 }
 0x16f   :  { %481 = vmatprep.subr.mxu1 %v372_v31  ;;  %v1327_v31 = vpop.permute.xlu0 %677 }
 0x170   :  { %482 = vmatpush1.msra.mxu1 %v371_v30 }
 0x171   :  { %483 = vmatprep.subr.mxu1 %v370_v29 }
 0x172   :  { %484 = vmatpush1.msra.mxu1 %v369_v26  ;;  %v662_v37 = vpop.permute.xlu1 %661 }
 0x173   :  { %485 = vmatprep.subr.mxu1 %v368_v55  ;;  %v1331_v29 = vpop.permute.xlu0 %689 }
 0x174   :  { %486 = vmatpush1.msra.mxu1 %v367_v56 }
 0x175   :  { %487 = vmatprep.subr.mxu1 %v366_v57 }
 0x176   :  { %488 = vmatpush1.msra.mxu1 %v365_v18  ;;  %v421_v44 = vpop.permute.xlu1 %420 }
 0x177   :  { %489 = vmatprep.subr.mxu1 %v364_v17  ;;  %v1335_v55 = vpop.permute.xlu0 %701 }
 0x178   :  { %490 = vmatpush1.msra.mxu1 %v363_v12 }
 0x179   :  { %491 = vmatprep.subr.mxu1 %v362_v61 }
 0x17a   :  { %492 = vmatpush1.msra.mxu1 %v361_v62  ;;  %v1315_v35 = vpop.permute.xlu1 %669 }
 0x17b   :  { %493 = vmatprep.subr.mxu1 %v360_v8  ;;  %v405_v58 = vpop.permute.xlu0 %404 }
 0x17c   :  { %494 = vmatpush1.msra.mxu1 %v359_v63 }
 0x17d   :  { %495 = vmatprep.subr.mxu1 %v358_v0 }
 0x17e   :  { %496 = vmatpush1.msra.mxu1 %v357_v5  ;;  %v1317_v46 = vpop.permute.xlu1 %673 }
 0x17f   :  { %497 = vmatprep.subr.mxu1 %v356_v40  ;;  %v417_v12 = vpop.permute.xlu0 %416 }
 0x180   :  { %498 = vmatpush1.msra.mxu1 %v355_v4 }
 0x181   :  { %532 = vmatmul.mubr.f32.vlgmr.msra.gmra.mxu1 %v387_v7 }
 0x182   :  { %537 = vmatprep.mubr.f32.mxu1 %v1003_v1  ;;  %v1319_v48 = vpop.permute.xlu1 %428 }
 0x183   :  { %v425_v0 = vpop.permute.xlu0 %424 }
 0x185   :  { %538 = vmatmul.mubr.f32.gmra.mxu1 %v388_v2 }
 0x186   :  { %543 = vmatprep.mubr.f32.mxu1 %v1003_v1  ;;  %v1321_v34 = vpop.permute.xlu1 %432 }
 0x189   :  { %544 = vmatmul.mubr.f32.gmra.mxu1 %v389_v3 }
 0x18a   :  { %549 = vmatprep.mubr.f32.mxu1 %v1003_v1  ;;  %v1323_v27 = vpop.permute.xlu1 %681 }
 0x18d   :  { %550 = vmatmul.mubr.f32.gmra.mxu1 %v390_v14 }
 0x18e   :  { %555 = vmatprep.mubr.f32.mxu1 %v1003_v1  ;;  %v1325_v50 = vpop.permute.xlu1 %685 }
 0x191   :  { %556 = vmatmul.mubr.f32.gmra.mxu1 %v391_v16 }
 0x192   :  { %561 = vmatprep.mubr.f32.mxu1 %v1003_v1  ;;  %v1329_v52 = vpop.permute.xlu1 %440 }
 0x195   :  { %562 = vmatmul.mubr.f32.gmra.mxu1 %v392_v36 }
 0x196   :  { %567 = vmatprep.mubr.f32.mxu1 %v1003_v1  ;;  %v1333_v25 = vpop.permute.xlu1 %444 }
 0x199   :  { %568 = vmatmul.mubr.f32.gmra.mxu1 %v393_v13 }
 0x19a   :  { %573 = vmatprep.mubr.f32.mxu1 %v1003_v1  ;;  %v1337_v21 = vpop.permute.xlu1 %693 }
 0x19d   :  { %574 = vmatmul.mubr.f32.gmra.mxu1 %v394_v32 }
 0x19e   :  { %579 = vmatprep.mubr.f32.mxu1 %v1003_v1  ;;  %v1339_v17 = vpop.permute.xlu1 %697 }
 0x1a1   :  { %580 = vmatmul.mubr.f32.gmra.mxu1 %v395_v23 }
 0x1a2   :  { %585 = vmatprep.mubr.f32.mxu1 %v1003_v1  ;;  %v1341_v3 = vpop.permute.xlu1 %452 }
 0x1a5   :  { %586 = vmatmul.mubr.f32.gmra.mxu1 %v396_v45 }
 0x1a6   :  { %591 = vmatprep.mubr.f32.mxu1 %v1003_v1 }
 0x1a9   :  { %592 = vmatmul.mubr.f32.gmra.mxu1 %v397_v47 }
 0x1aa   :  { %597 = vmatprep.mubr.f32.mxu1 %v1003_v1 }
 0x1ad   :  { %598 = vmatmul.mubr.f32.gmra.mxu1 %v398_v41 }
 0x1ae   :  { %603 = vmatprep.mubr.f32.mxu1 %v1003_v1 }
 0x1b1   :  { %604 = vmatmul.mubr.f32.gmra.mxu1 %v399_v43 }
 0x1b2   :  { %609 = vmatprep.mubr.f32.mxu1 %v1003_v1 }
 0x1b5   :  { %610 = vmatmul.mubr.f32.gmra.mxu1 %v400_v42 }
 0x1b6   :  { %615 = vmatprep.mubr.f32.mxu1 %v1003_v1 }
 0x1b9   :  { %616 = vmatmul.mubr.f32.gmra.mxu1 %v401_v28 }
 0x1ba   :  { %621 = vmatprep.mubr.f32.mxu1 %v1003_v1 }
 0x1bd   :  { %622 = vmatmul.mubr.f32.gmra.mxu1 %v402_v24 }
 0x241   :  { %v533_v49 = vpop.f32.mrf.mxu1 }
 0x242   :  { %v534_v59 = vadd.f32 %v533_v49, %v405_v58 }
 0x243   :  { %v535_v1 = vpop.f32.mrf.mxu1 }
 0x244   :  { %v536_v9 = vadd.f32 %v535_v1, %v405_v58  ;;  %v628_v63 = vmax.f32 %v534_v59, 0.0  ;;  %v437_v58 = vpop.permute.xlu0 %436 }
 0x245   :  { %v539_v51 = vpop.f32.mrf.mxu1 }
 0x246   :  { %v540_v20 = vadd.f32 %v539_v51, %v409_v38  ;;  %v629_v14 = vmax.f32 %v536_v9, 0.0  ;;  %v724_v45 = vmul.f32 %v662_v37, %v628_v63 }
 0x247   :  { %v541_v30 = vpop.f32.mrf.mxu1 }
 0x248   :  { %v542_v60 = vadd.f32 %v541_v30, %v409_v38  ;;  %v630_v62 = vmax.f32 %v540_v20, 0.0  ;;  %v725_v38 = vmul.f32 %v662_v37, %v629_v14 }
 0x249   :  { %v545_v53 = vpop.f32.mrf.mxu1 }
 0x24a   :  { %v546_v10 = vadd.f32 %v545_v53, %v413_v39  ;;  %v631_v5 = vmax.f32 %v542_v60, 0.0  ;;  %v726_v16 = vmul.f32 %v666_v33, %v630_v62 }
 0x24b   :  { %v547_v11 = vpop.f32.mrf.mxu1 }
 0x24c   :  { %v548_v15 = vadd.f32 %v547_v11, %v413_v39  ;;  %v632_v40 = vmax.f32 %v546_v10, 0.0  ;;  %v727_v41 = vmul.f32 %v666_v33, %v631_v5  ;;  %v756_v1 = vadd.f32 %v726_v16, %v724_v45  ;;  %v1347_v11 = vpop.permute.xlu1 %456 }
 0x24d   :  { %v551_v26 = vpop.f32.mrf.mxu1 }
 0x24e   :  { %v552_v8 = vadd.f32 %v551_v26, %v417_v12  ;;  %v633_v36 = vmax.f32 %v548_v15, 0.0  ;;  %v728_v43 = vmul.f32 %v1315_v35, %v632_v40 }
 0x24f   :  { %v553_v54 = vpop.f32.mrf.mxu1 }
 0x250   :  { %v554_v4 = vadd.f32 %v553_v54, %v417_v12  ;;  %v634_v13 = vmax.f32 %v552_v8, 0.0  ;;  %v729_v51 = vmul.f32 %v1315_v35, %v633_v36 }
 0x251   :  { %v557_v22 = vpop.f32.mrf.mxu1 }
 0x252   :  { %v558_v7 = vadd.f32 %v557_v22, %v421_v44  ;;  %v635_v42 = vmax.f32 %v554_v4, 0.0  ;;  %v730_v30 = vmul.f32 %v1317_v46, %v634_v13  ;;  %v777_v22 = vadd.f32 %v727_v41, %v725_v38 }
 0x253   :  { %v559_v56 = vpop.f32.mrf.mxu1 }
 0x254   :  { %v560_v32 = vadd.f32 %v559_v56, %v421_v44  ;;  %v636_v28 = vmax.f32 %v558_v7, 0.0  ;;  %v757_v56 = vadd.f32 %v756_v1, %v728_v43  ;;  %v731_v37 = vmul.f32 %v1317_v46, %v635_v42 }
 0x255   :  { %v563_v57 = vpop.f32.mrf.mxu1  ;;  %v778_v12 = vadd.f32 %v777_v22, %v729_v51 }
 0x256   :  { %v564_v47 = vadd.f32 %v563_v57, %v425_v0  ;;  %v637_v53 = vmax.f32 %v560_v32, 0.0  ;;  %v732_v57 = vmul.f32 %v1327_v31, %v636_v28  ;;  %v758_v60 = vadd.f32 %v757_v56, %v730_v30  ;;  %v449_v32 = vpop.permute.xlu0 %448 }
 0x257   :  { %v565_v18 = vpop.f32.mrf.mxu1  ;;  %v779_v46 = vadd.f32 %v778_v12, %v731_v37 }
 0x258   :  { %v566_v39 = vadd.f32 %v565_v18, %v425_v0  ;;  %v638_v26 = vmax.f32 %v564_v47, 0.0  ;;  %v733_v10 = vmul.f32 %v1327_v31, %v637_v53  ;;  %v759_v8 = vadd.f32 %v758_v60, %v732_v57  ;;  %v706_v0 = vpop.permute.xlu1 %705 }
 0x259   :  { %v569_v19 = vpop.f32.mrf.mxu1 }
 0x25a   :  { %v570_v49 = vadd.f32 %v569_v19, %v1319_v48  ;;  %v639_v35 = vmax.f32 %v566_v39, 0.0  ;;  %v780_v7 = vadd.f32 %v779_v46, %v733_v10  ;;  %v461_v22 = vpop.permute.xlu0 %460 }
 0x25b   :  { %v571_v61 = vpop.f32.mrf.mxu1 }
 0x25c   :  { %v572_v33 = vadd.f32 %v571_v61, %v1319_v48  ;;  %v640_v20 = vmax.f32 %v570_v49, 0.0  ;;  %v734_v61 = vmul.f32 %v1323_v27, %v638_v26  ;;  %v735_v5 = vmul.f32 %v1323_v27, %v639_v35  ;;  %v710_v49 = vpop.permute.xlu1 %709 }
 0x25d   :  { %v575_v6 = vpop.f32.mrf.mxu1 }
 0x25e   :  { %v576_v54 = vadd.f32 %v575_v6, %v1321_v34  ;;  %v641_v9 = vmax.f32 %v572_v33, 0.0  ;;  %v760_v16 = vadd.f32 %v759_v8, %v734_v61  ;;  %v781_v43 = vadd.f32 %v780_v7, %v735_v5  ;;  %v714_v46 = vpop.permute.xlu0 %713 }
 0x25f   :  { %v577_v2 = vpop.f32.mrf.mxu1 }
 0x260   :  { %v578_v19 = vadd.f32 %v577_v2, %v1321_v34  ;;  %v642_v62 = vmax.f32 %v576_v54, 0.0  ;;  %v736_v34 = vmul.f32 %v1325_v50, %v640_v20  ;;  %v737_v36 = vmul.f32 %v1325_v50, %v641_v9 }
 0x261   :  { %v581_v23 = vpop.f32.mrf.mxu1 }
 0x262   :  { %v582_v59 = vadd.f32 %v581_v23, %v437_v58  ;;  %v643_v40 = vmax.f32 %v578_v19, 0.0  ;;  %v738_v13 = vmul.f32 %v1331_v29, %v642_v62  ;;  %v761_v42 = vadd.f32 %v760_v16, %v736_v34 }
 0x263   :  { %v583_v24 = vpop.f32.mrf.mxu1  ;;  %v782_v1 = vadd.f32 %v781_v43, %v737_v36 }
 0x264   :  { %v584_v15 = vadd.f32 %v583_v24, %v437_v58  ;;  %v644_v4 = vmax.f32 %v582_v59, 0.0  ;;  %v739_v28 = vmul.f32 %v1331_v29, %v643_v40  ;;  %v762_v51 = vadd.f32 %v761_v42, %v738_v13 }
 0x265   :  { %v587_v44 = vpop.f32.mrf.mxu1 }
 0x266   :  { %v588_v6 = vadd.f32 %v587_v44, %v1329_v52  ;;  %v645_v23 = vmax.f32 %v584_v15, 0.0  ;;  %v783_v54 = vadd.f32 %v782_v1, %v739_v28 }
 0x267   :  { %v589_v18 = vpop.f32.mrf.mxu1 }
 0x268   :  { %v590_v31 = vadd.f32 %v589_v18, %v1329_v52  ;;  %v646_v45 = vmax.f32 %v588_v6, 0.0  ;;  %v740_v52 = vmul.f32 %v1337_v21, %v644_v4  ;;  %v741_v30 = vmul.f32 %v1337_v21, %v645_v23  ;;  %v465_v21 = vpop.permute.xlu1 %464 }
 0x269   :  { %v593_v48 = vpop.f32.mrf.mxu1 }
 0x26a   :  { %v594_v2 = vadd.f32 %v593_v48, %v1333_v25  ;;  %v647_v24 = vmax.f32 %v590_v31, 0.0  ;;  %v763_v29 = vadd.f32 %v762_v51, %v740_v52  ;;  %v784_v20 = vadd.f32 %v783_v54, %v741_v30 }
 0x26b   :  { %v595_v63 = vpop.f32.mrf.mxu1  ;;  %v1006_v54 = vmov 1966171168  }
 0x26c   :  { %v596_v27 = vadd.f32 %v595_v63, %v1333_v25  ;;  %v648_v38 = vmax.f32 %v594_v2, 0.0  ;;  %v742_v25 = vmul.f32 %v1339_v17, %v646_v45  ;;  %v743_v37 = vmul.f32 %v1339_v17, %v647_v24  ;;  %v718_v4 = vpop.permute.xlu1 %717 }
 0x26d   :  { %v599_v14 = vpop.f32.mrf.mxu1 }
 0x26e   :  { %v600_v47 = vadd.f32 %v599_v14, %v449_v32  ;;  %v649_v44 = vmax.f32 %v596_v27, 0.0  ;;  %v744_v57 = vmul.f32 %v1335_v55, %v648_v38  ;;  %v764_v59 = vadd.f32 %v763_v29, %v742_v25 }
 0x26f   :  { %v601_v41 = vpop.f32.mrf.mxu1  ;;  %v785_v9 = vadd.f32 %v784_v20, %v743_v37  ;;  %v806_v29 = vunpack.c.l.s4 %v1006_v54 }
 0x270   :  { %v602_v39 = vadd.f32 %v601_v41, %v449_v32  ;;  %v650_v26 = vmax.f32 %v600_v47, 0.0  ;;  %v745_v12 = vmul.f32 %v1335_v55, %v649_v44  ;;  %v765_v17 = vadd.f32 %v764_v59, %v744_v57  ;;  %v722_v42 = vpop.permute.xlu1 %721 }
 0x271   :  { %v605_v50 = vpop.f32.mrf.mxu1 }
 0x272   :  { %v606_v53 = vadd.f32 %v605_v50, %v1341_v3  ;;  %v651_v58 = vmax.f32 %v602_v39, 0.0  ;;  %v746_v60 = vmul.f32 %v706_v0, %v650_v26  ;;  %v786_v5 = vadd.f32 %v785_v9, %v745_v12 }
 0x273   :  { %v607_v33 = vpop.f32.mrf.mxu1 }
 0x274   :  { %v608_v56 = vadd.f32 %v607_v33, %v1341_v3  ;;  %v652_v18 = vmax.f32 %v606_v53, 0.0  ;;  %v747_v62 = vmul.f32 %v706_v0, %v651_v58  ;;  %v766_v34 = vadd.f32 %v765_v17, %v746_v60 }
 0x275   :  { %v611_v35 = vpop.f32.mrf.mxu1 }
 0x276   :  { %v612_v19 = vadd.f32 %v611_v35, %v1347_v11  ;;  %v653_v10 = vmax.f32 %v608_v56, 0.0  ;;  %v748_v15 = vmul.f32 %v710_v49, %v652_v18  ;;  %v787_v14 = vadd.f32 %v786_v5, %v747_v62 }
 0x277   :  { %v613_v48 = vpop.f32.mrf.mxu1  ;;  %v807_v18 = vunpack.c.0.s8 %v806_v29 }
 0x278   :  { %v654_v61 = vmax.f32 %v612_v19, 0.0  ;;  %v614_v3 = vadd.f32 %v613_v48, %v1347_v11  ;;  %v749_v40 = vmul.f32 %v710_v49, %v653_v10  ;;  %v767_v16 = vadd.f32 %v766_v34, %v748_v15 }
 0x279   :  { %v617_v8 = vpop.f32.mrf.mxu1 }
 0x27a   :  { %v655_v6 = vmax.f32 %v614_v3, 0.0  ;;  %v618_v63 = vadd.f32 %v617_v8, %v461_v22  ;;  %v750_v55 = vmul.f32 %v714_v46, %v654_v61  ;;  %v788_v23 = vadd.f32 %v787_v14, %v749_v40 }
 0x27b   :  { %v619_v7 = vpop.f32.mrf.mxu1 }
 0x27c   :  { %v656_v31 = vmax.f32 %v618_v63, 0.0  ;;  %v620_v2 = vadd.f32 %v619_v7, %v461_v22  ;;  %v751_v11 = vmul.f32 %v714_v46, %v655_v6  ;;  %v768_v27 = vadd.f32 %v767_v16, %v750_v55 }
 0x27d   :  { %v623_v36 = vpop.f32.mrf.mxu1  ;;  %v808_v22 = vlaneseq }
 0x27e   :  { %v752_v13 = vmul.f32 %v718_v4, %v656_v31  ;;  %v657_v32 = vmax.f32 %v620_v2, 0.0  ;;  %v624_v0 = vadd.f32 %v623_v36, %v465_v21  ;;  %v789_v28 = vadd.f32 %v788_v23, %v751_v11 }
 0x27f   :  { %v625_v45 = vpop.f32.mrf.mxu1  ;;  %v809_v35 = vshrl.u32 %v808_v22, 7  ;;  %vm822_vm0 = vcmp.lt.s32.totalorder %v808_v22, 256 }
 0x280   :  { %v753_v47 = vmul.f32 %v718_v4, %v657_v32  ;;  %v658_v41 = vmax.f32 %v624_v0, 0.0  ;;  %v626_v43 = vadd.f32 %v625_v45, %v465_v21  ;;  %v769_v52 = vadd.f32 %v768_v27, %v752_v13 }
 0x281   :  { %v799_v21 = vstv %s1385_s4  ;;  %v810_v12 = vsub.s32 %v807_v18, %v809_v35 }
 0x282   :  { %v754_v24 = vmul.f32 %v722_v42, %v658_v41  ;;  %v659_v38 = vmax.f32 %v626_v43, 0.0  ;;  %v790_v39 = vadd.f32 %v789_v28, %v753_v47 }
 0x284   :  { %v770_v49 = vadd.f32 %v769_v52, %v754_v24  ;;  %v755_v50 = vmul.f32 %v722_v42, %v659_v38 }
 0x286   :  { %v771_v1 = vrot.slane %v770_v49, 4  ;;  %v791_v51 = vadd.f32 %v790_v39, %v755_v50 }
 0x288   :  { %v772_v30 = vadd.f32 %v771_v1, %v770_v49  ;;  %v792_v53 = vrot.slane %v791_v51, 4 }
 0x28a   :  { %v773_v25 = vrot.slane %v772_v30, 2  ;;  %v793_v44 = vadd.f32 %v792_v53, %v791_v51 }
 0x28c   :  { %v774_v26 = vadd.f32 %v773_v25, %v772_v30  ;;  %v794_v33 = vrot.slane %v793_v44, 2 }
 0x28e   :  { %v775_v56 = vrot.slane %v774_v26, 1  ;;  %v795_v37 = vadd.f32 %v794_v33, %v793_v44 }
 0x290   :  { %v776_v57 = vadd.f32 %v775_v56, %v774_v26  ;;  %v796_v58 = vrot.slane %v795_v37, 1 }
 0x292   :  { %v797_v20 = vadd.f32 %v796_v58, %v795_v37  ;;  %v800_v19 = vadd.f32 %v799_v21, %v776_v57 }
 0x294   :  { %v801_v59 = vadd.f32 %v799_v21, %v797_v20 }
 0x296   :  { %v804_v60 = vcombine.low %v800_v19, %v801_v59 }
 0x298   :  { %v811_v10 = vrot.slane %v804_v60, %v810_v12 }
 0x29a   :  { %v818_v48 = vrot.slane %v811_v10, %v810_v12 }
 0x29c   :  { %824 = vst.msk [vmem:[#allocation8] sm:$0x3] %vm822_vm0, %v818_v48 }
 0x29d   :  { %983 = shalt.err (!%p980_p0)
}
 0x29e   :  { %834 = dma.vmem_to_hbm [thread:$0]  %s832_s13, 32, %s1386_s5, [#allocation5]  }
 0x29f   :  { %996 = dma.done.wait [#allocation5], 32  }
 0x2a0   :  { %997 = vsyncadd [#allocation5], 4294967264 }
 0x2a1   :  { %838 = vsyncpa [#allocation4], 1 }
 0x2a2   :  { %839 = vsyncpa [#allocation7], 1 }
 0x2a3   :  { %840 = vsyncpa [#allocation5], 1 }

// kernel: tpu_custom_call.1
= control target key start
LH: loop header
LB: loop body
LE: loop exit
PB: predicated region body
PF: predicated region fallthrough
CT: control target
= control target key end

     0   :  { %11 = vsyncpa [#allocation4], 0  ;;  %s1381_s0 = inlined_call_operand.hbm [shape: f32[256,128], index: 0, kind: input, shape index: {}]   ;;  %s1382_s1 = inlined_call_operand.vmem [shape: f32[128,128], index: 1, kind: input, shape index: {}]   ;;  %s1383_s2 = inlined_call_operand.hbm [shape: f32[128,128], index: 2, kind: input, shape index: {}]   ;;  %s1384_s3 = inlined_call_operand.vmem [shape: f32[128,3], index: 3, kind: input, shape index: {}]   ;;  %s1385_s4 = inlined_call_operand.<no memory space> [shape: f32[1,1], index: 4, kind: input, shape index: {}]   ;;  %s1386_s5 = inlined_call_operand.hbm [shape: f32[1,256], index: 5, kind: output, shape index: {}]  }
   0x1   :  { %12 = vsyncpa [#allocation7], 0 }
   0x2   :  { %13 = vsyncpa [#allocation5], 0  ;;  %s998_s18 = smov [#allocation3]  }
   0x3   :  { %s19_s19 = sshll.u32 %s998_s18, 4  ;;  %s20_s19 = int_to_ptr.vmem [resolvable:$true] %s19_s19 }
   0x4   :  { %s940_s20 = scalar_lea.vmem %s20_s19, 4096  ;;  %p945_p1 = scmp.lt.s32.totalorder %s20_s19, %s20_s19 }
   0x5   :  { %p941_p0 = scmp.ne.s32.totalorder %s20_s19, %s940_s20  ;;  %p946_p2 = scmp.lt.s32.totalorder %s940_s20, %s940_s20 }
   0x7   :  { %p947_p3 = por %p946_p2, %p945_p1 }
   0x9   :  { %p948_p4 = pnand %p947_p3, %p941_p0 }
   0xb   :  { %951 = shalt.err (!%p948_p4)
}
   0xc   :  { %s999_s21 = smov 128   ;;  %s1000_s22 = smov 8  }
   0xd   :  { %25 = dma.hbm_to_vmem [thread:$0]  %s1381_s0, 4096, %s20_s19, [#allocation4], %s999_s21, %s999_s21, %s1000_s22  }
   0xe   :  { %s1001_s25 = smov [#allocation6]  }
   0xf   :  { %s33_s26 = sshll.u32 %s1001_s25, 4  ;;  %s34_s26 = int_to_ptr.vmem [resolvable:$true] %s33_s26 }
  0x10   :  { %s960_s27 = scalar_lea.vmem %s34_s26, 2048  ;;  %p965_p6 = scmp.lt.s32.totalorder %s34_s26, %s34_s26 }
  0x11   :  { %p961_p5 = scmp.ne.s32.totalorder %s34_s26, %s960_s27  ;;  %p966_p7 = scmp.lt.s32.totalorder %s960_s27, %s960_s27 }
  0x13   :  { %p967_p8 = por %p966_p7, %p965_p6 }
  0x15   :  { %p968_p9 = pnand %p967_p8, %p961_p5 }
  0x17   :  { %971 = shalt.err (!%p968_p9)
}
  0x18   :  { %39 = dma.hbm_to_vmem [thread:$0]  %s1383_s2, 2048, %s34_s26, [#allocation7], %s999_s21, %s999_s21, %s1000_s22  }
  0x19   :  { %992 = dma.done.wait [#allocation4], 4096  }
  0x1a   :  { %993 = vsyncadd [#allocation4], 4294963200 }
  0x1b   :  { %994 = dma.done.wait [#allocation7], 2048  }
  0x1c   :  { %995 = vsyncadd [#allocation7], 4294965248  ;;  %v1002_v0 = vmov 0   ;;  %v97_v1 = vld [vmem:[#allocation3 + $0xf8] sm:$0xff]  ;;  %v96_v3 = vld [vmem:[#allocation3 + $0xf0] sm:$0xff]  ;;  %s1007_s12 = smov [#allocation8]  }
  0x1d   :  { %916 = vset.pattern.permute.xlu1 %v1002_v0  ;;  %915 = vset.pattern.permute.xlu0 %v1002_v0  ;;  %v81_v2 = vld [vmem:[#allocation3 + $0x78] sm:$0xff]  ;;  %v80_v4 = vld [vmem:[#allocation3 + $0x70] sm:$0xff]  ;;  %v95_v5 = vld [vmem:[#allocation3 + $0xe8] sm:$0xff]  ;;  %s831_s13 = sshll.u32 %s1007_s12, 4  ;;  %s832_s13 = int_to_ptr.vmem [resolvable:$true] %s831_s13 }
  0x1e   :  { %841 = vmatprep.subr.mxu0 %v97_v1  ;;  %v79_v6 = vld [vmem:[#allocation3 + $0x68] sm:$0xff]  ;;  %v94_v7 = vld [vmem:[#allocation3 + $0xe0] sm:$0xff]  ;;  %v93_v10 = vld [vmem:[#allocation3 + $0xd8] sm:$0xff]  ;;  %v1003_v1 = vmov 0.0   ;;  %s972_s14 = scalar_lea.vmem %s832_s13, 32  ;;  %p977_p11 = scmp.lt.s32.totalorder %s832_s13, %s832_s13 }
  0x1f   :  { %842 = vmatpush3.xpose.msra.mxu0 %v81_v2  ;;  %v1047_v8 = vld [vmem:[%s1382_s1] sm:$0xff]  ;;  %v1053_v11 = vld [vmem:[%s1384_s3 + $0x68] sm:$0xff]  ;;  %v77_v12 = vld [vmem:[#allocation3 + $0x58] sm:$0xff]  ;;  %531 = vmatprep.mubr.f32.mxu1 %v1003_v1  ;;  %p973_p10 = scmp.ne.s32.totalorder %s832_s13, %s972_s14  ;;  %p978_p12 = scmp.lt.s32.totalorder %s972_s14, %s972_s14 }
  0x20   :  { %843 = vmatprep.subr.mxu0 %v96_v3  ;;  %v78_v9 = vld [vmem:[#allocation3 + $0x60] sm:$0xff]  ;;  %873 = vmatprep.mubr.f32.mxu0 %v1047_v8  ;;  %v1059_v13 = vld [vmem:[%s1384_s3 + $0x78] sm:$0xff]  ;;  %v92_v14 = vld [vmem:[#allocation3 + $0xd0] sm:$0xff] }
  0x21   :  { %181 = vperm.xlu1 %916, %v1053_v11   ;;  %191 = vperm.xlu0 %915, %v1059_v13   ;;  %v1065_v15 = vld [vmem:[%s1384_s3 + $0x60] sm:$0xff]  ;;  %v1070_v16 = vld [vmem:[%s1384_s3 + $0x70] sm:$0xff]  ;;  %v91_v18 = vld [vmem:[#allocation3 + $0xc8] sm:$0xff]  ;;  %p979_p13 = por %p978_p12, %p977_p11 }
  0x22   :  { %v76_v17 = vld [vmem:[#allocation3 + $0x50] sm:$0xff]  ;;  %v1082_v20 = vld [vmem:[%s1384_s3 + $0x58] sm:$0xff]  ;;  %v75_v21 = vld [vmem:[#allocation3 + $0x48] sm:$0xff] }
  0x23   :  { %844 = vmatpush3.xpose.msra.mxu0 %v80_v4  ;;  %v1077_v19 = vld [vmem:[%s1384_s3 + $0x50] sm:$0xff]  ;;  %v90_v22 = vld [vmem:[#allocation3 + $0xc0] sm:$0xff]  ;;  %v1094_v24 = vld [vmem:[%s1384_s3 + $0x48] sm:$0xff]  ;;  %p980_p0 = pnand %p979_p13, %p973_p10 }
  0x24   :  { %845 = vmatprep.subr.mxu0 %v95_v5  ;;  %v1089_v23 = vld [vmem:[%s1384_s3 + $0x40] sm:$0xff]  ;;  %v89_v26 = vld [vmem:[#allocation3 + $0xb8] sm:$0xff]  ;;  %v1101_v27 = vld [vmem:[%s1384_s3 + $0x30] sm:$0xff] }
  0x25   :  { %176 = vperm.xlu1 %916, %v1065_v15   ;;  %186 = vperm.xlu0 %915, %v1070_v16   ;;  %v74_v25 = vld [vmem:[#allocation3 + $0x40] sm:$0xff]  ;;  %v1106_v28 = vld [vmem:[%s1384_s3 + $0x38] sm:$0xff]  ;;  %v88_v30 = vld [vmem:[#allocation3 + $0xb0] sm:$0xff] }
  0x26   :  { %v73_v29 = vld [vmem:[#allocation3 + $0x38] sm:$0xff]  ;;  %v1113_v31 = vld [vmem:[%s1384_s3 + $0x20] sm:$0xff]  ;;  %v1118_v32 = vld [vmem:[%s1384_s3 + $0x28] sm:$0xff] }
  0x27   :  { %846 = vmatpush3.xpose.msra.mxu0 %v79_v6  ;;  %v72_v33 = vld [vmem:[#allocation3 + $0x30] sm:$0xff]  ;;  %v87_v34 = vld [vmem:[#allocation3 + $0xa8] sm:$0xff]  ;;  %v1130_v36 = vld [vmem:[%s1384_s3 + $0x18] sm:$0xff] }
  0x28   :  { %847 = vmatprep.subr.mxu0 %v94_v7  ;;  %v1125_v35 = vld [vmem:[%s1384_s3 + $0x10] sm:$0xff]  ;;  %v71_v37 = vld [vmem:[#allocation3 + $0x28] sm:$0xff]  ;;  %v86_v38 = vld [vmem:[#allocation3 + $0xa0] sm:$0xff]  ;;  %v1004_v7 = vmov 1  }
  0x29   :  { %166 = vperm.xlu1 %916, %v1077_v19   ;;  %171 = vperm.xlu0 %915, %v1082_v20   ;;  %v1137_v39 = vld [vmem:[%s1384_s3] sm:$0xff]  ;;  %v1142_v40 = vld [vmem:[%s1384_s3 + $0x8] sm:$0xff]  ;;  %v85_v42 = vld [vmem:[#allocation3 + $0x98] sm:$0xff] }
  0x2a   :  { %v70_v41 = vld [vmem:[#allocation3 + $0x20] sm:$0xff]  ;;  %v69_v43 = vld [vmem:[#allocation3 + $0x18] sm:$0xff]  ;;  %v84_v44 = vld [vmem:[#allocation3 + $0x90] sm:$0xff] }
  0x2b   :  { %848 = vmatpush3.xpose.msra.mxu0 %v78_v9  ;;  %v68_v45 = vld [vmem:[#allocation3 + $0x10] sm:$0xff]  ;;  %v83_v46 = vld [vmem:[#allocation3 + $0x88] sm:$0xff]  ;;  %v82_v48 = vld [vmem:[#allocation3 + $0x80] sm:$0xff] }
  0x2c   :  { %849 = vmatprep.subr.mxu0 %v93_v10  ;;  %v67_v47 = vld [vmem:[#allocation3 + $0x8] sm:$0xff]  ;;  %v66_v49 = vld [vmem:[#allocation3] sm:$0xff]  ;;  %v52_v51 = vld [vmem:[%s1382_s1 + $0x10] sm:$0xff] }
  0x2d   :  { %156 = vperm.xlu1 %916, %v1089_v23   ;;  %161 = vperm.xlu0 %915, %v1094_v24   ;;  %v51_v50 = vld [vmem:[%s1382_s1 + $0x8] sm:$0xff]  ;;  %v53_v52 = vld [vmem:[%s1382_s1 + $0x18] sm:$0xff]  ;;  %v54_v53 = vld [vmem:[%s1382_s1 + $0x20] sm:$0xff] }
  0x2e   :  { %v55_v54 = vld [vmem:[%s1382_s1 + $0x28] sm:$0xff]  ;;  %v56_v55 = vld [vmem:[%s1382_s1 + $0x30] sm:$0xff]  ;;  %v57_v56 = vld [vmem:[%s1382_s1 + $0x38] sm:$0xff] }
  0x2f   :  { %850 = vmatpush3.xpose.msra.mxu0 %v77_v12  ;;  %v58_v57 = vld [vmem:[%s1382_s1 + $0x40] sm:$0xff]  ;;  %v59_v58 = vld [vmem:[%s1382_s1 + $0x48] sm:$0xff]  ;;  %v60_v59 = vld [vmem:[%s1382_s1 + $0x50] sm:$0xff] }
  0x30   :  { %851 = vmatprep.subr.mxu0 %v92_v14  ;;  %v61_v60 = vld [vmem:[%s1382_s1 + $0x58] sm:$0xff]  ;;  %v62_v61 = vld [vmem:[%s1382_s1 + $0x60] sm:$0xff]  ;;  %v63_v62 = vld [vmem:[%s1382_s1 + $0x68] sm:$0xff]  ;;  %v1005_v14 = vmov 2  }
  0x31   :  { %146 = vperm.xlu1 %916, %v1101_v27   ;;  %151 = vperm.xlu0 %915, %v1106_v28   ;;  %v64_v63 = vld [vmem:[%s1382_s1 + $0x70] sm:$0xff]  ;;  %v65_v0 = vld [vmem:[%s1382_s1 + $0x78] sm:$0xff] }
  0x33   :  { %852 = vmatpush3.xpose.msra.mxu0 %v76_v17 }
  0x34   :  { %853 = vmatprep.subr.mxu0 %v91_v18 }
  0x35   :  { %136 = vperm.xlu1 %916, %v1113_v31   ;;  %141 = vperm.xlu0 %915, %v1118_v32  }
  0x37   :  { %854 = vmatpush3.xpose.msra.mxu0 %v75_v21 }
  0x38   :  { %855 = vmatprep.subr.mxu0 %v90_v22 }
  0x39   :  { %126 = vperm.xlu1 %916, %v1125_v35   ;;  %131 = vperm.xlu0 %915, %v1130_v36  }
  0x3b   :  { %856 = vmatpush3.xpose.msra.mxu0 %v74_v25 }
  0x3c   :  { %857 = vmatprep.subr.mxu0 %v89_v26 }
  0x3d   :  { %116 = vperm.xlu1 %916, %v1137_v39   ;;  %121 = vperm.xlu0 %915, %v1142_v40  }
  0x3f   :  { %858 = vmatpush3.xpose.msra.mxu0 %v73_v29 }
  0x40   :  { %859 = vmatprep.subr.mxu0 %v88_v30 }
  0x41   :  { %917 = vset.pattern.permute.xlu1 %v1004_v7  ;;  %919 = vset.pattern.permute.xlu0 %v1005_v14 }
  0x42   :  { %408 = vperm.xlu1 %917, %v1142_v40   ;;  %665 = vperm.xlu0 %919, %v1142_v40  }
  0x43   :  { %860 = vmatpush3.xpose.msra.mxu0 %v72_v33 }
  0x44   :  { %861 = vmatprep.subr.mxu0 %v87_v34 }
  0x46   :  { %412 = vperm.xlu1 %917, %v1125_v35   ;;  %677 = vperm.xlu0 %919, %v1113_v31  }
  0x47   :  { %862 = vmatpush3.xpose.msra.mxu0 %v71_v37 }
  0x48   :  { %863 = vmatprep.subr.mxu0 %v86_v38 }
  0x4a   :  { %918 = vset.pattern.permute.xlu1 %v1005_v14  ;;  %689 = vperm.xlu0 %919, %v1106_v28  }
  0x4b   :  { %864 = vmatpush3.xpose.msra.mxu0 %v70_v41  ;;  %661 = vperm.xlu1 %918, %v1137_v39  }
  0x4c   :  { %865 = vmatprep.subr.mxu0 %v85_v42 }
  0x4e   :  { %701 = vperm.xlu0 %919, %v1077_v19  }
  0x4f   :  { %866 = vmatpush3.xpose.msra.mxu0 %v69_v43  ;;  %920 = vset.pattern.permute.xlu1 %v1004_v7 }
  0x50   :  { %867 = vmatprep.subr.mxu0 %v84_v44  ;;  %420 = vperm.xlu1 %920, %v1113_v31  }
  0x52   :  { %927 = vset.pattern.permute.xlu0 %v1004_v7 }
  0x53   :  { %868 = vmatpush3.xpose.msra.mxu0 %v68_v45  ;;  %404 = vperm.xlu0 %927, %v1137_v39  }
  0x54   :  { %869 = vmatprep.subr.mxu0 %v83_v46  ;;  %921 = vset.pattern.permute.xlu1 %v1005_v14 }
  0x55   :  { %669 = vperm.xlu1 %921, %v1125_v35  }
  0x57   :  { %870 = vmatpush3.xpose.msra.mxu0 %v67_v47  ;;  %416 = vperm.xlu0 %927, %v1130_v36  }
  0x58   :  { %871 = vmatprep.subr.mxu0 %v82_v48 }
  0x59   :  { %673 = vperm.xlu1 %921, %v1130_v36  }
  0x5b   :  { %872 = vmatpush3.xpose.msra.mxu0 %v66_v49  ;;  %424 = vperm.xlu0 %927, %v1118_v32  }
  0x5d   :  { %922 = vset.pattern.permute.xlu1 %v1004_v7 }
  0x5e   :  { %874 = vmatmul.mubr.f32.vlgmr.msra.gmra.mxu0 %v1047_v8  ;;  %428 = vperm.xlu1 %922, %v1101_v27  }
  0x5f   :  { %875 = vmatprep.mubr.f32.mxu0 %v51_v50  ;;  %436 = vperm.xlu0 %927, %v1089_v23  }
  0x62   :  { %876 = vmatmul.mubr.f32.gmra.mxu0 %v51_v50  ;;  %432 = vperm.xlu1 %922, %v1106_v28  }
  0x63   :  { %877 = vmatprep.mubr.f32.mxu0 %v52_v51  ;;  %448 = vperm.xlu0 %927, %v1082_v20  }
  0x66   :  { %878 = vmatmul.mubr.f32.gmra.mxu0 %v52_v51  ;;  %923 = vset.pattern.permute.xlu1 %v1005_v14 }
  0x67   :  { %879 = vmatprep.mubr.f32.mxu0 %v53_v52  ;;  %681 = vperm.xlu1 %923, %v1118_v32  }
  0x68   :  { %460 = vperm.xlu0 %927, %v1070_v16  }
  0x6a   :  { %880 = vmatmul.mubr.f32.gmra.mxu0 %v53_v52 }
  0x6b   :  { %881 = vmatprep.mubr.f32.mxu0 %v54_v53  ;;  %685 = vperm.xlu1 %923, %v1101_v27  }
  0x6c   :  { %930 = vset.pattern.permute.xlu0 %v1005_v14 }
  0x6d   :  { %713 = vperm.xlu0 %930, %v1053_v11  }
  0x6e   :  { %882 = vmatmul.mubr.f32.gmra.mxu0 %v54_v53 }
  0x6f   :  { %883 = vmatprep.mubr.f32.mxu0 %v55_v54  ;;  %924 = vset.pattern.permute.xlu1 %v1004_v7 }
  0x70   :  { %440 = vperm.xlu1 %924, %v1094_v24  }
  0x72   :  { %884 = vmatmul.mubr.f32.gmra.mxu0 %v55_v54 }
  0x73   :  { %885 = vmatprep.mubr.f32.mxu0 %v56_v55 }
  0x74   :  { %444 = vperm.xlu1 %924, %v1077_v19  }
  0x76   :  { %886 = vmatmul.mubr.f32.gmra.mxu0 %v56_v55 }
  0x77   :  { %887 = vmatprep.mubr.f32.mxu0 %v57_v56 }
  0x78   :  { %925 = vset.pattern.permute.xlu1 %v1005_v14 }
  0x79   :  { %693 = vperm.xlu1 %925, %v1089_v23  }
  0x7a   :  { %888 = vmatmul.mubr.f32.gmra.mxu0 %v57_v56 }
  0x7b   :  { %889 = vmatprep.mubr.f32.mxu0 %v58_v57 }
  0x7d   :  { %697 = vperm.xlu1 %925, %v1094_v24  }
  0x7e   :  { %890 = vmatmul.mubr.f32.gmra.mxu0 %v58_v57 }
  0x7f   :  { %891 = vmatprep.mubr.f32.mxu0 %v59_v58 }
  0x81   :  { %926 = vset.pattern.permute.xlu1 %v1004_v7 }
  0x82   :  { %892 = vmatmul.mubr.f32.gmra.mxu0 %v59_v58  ;;  %452 = vperm.xlu1 %926, %v1065_v15  }
  0x83   :  { %893 = vmatprep.mubr.f32.mxu0 %v60_v59 }
  0x86   :  { %894 = vmatmul.mubr.f32.gmra.mxu0 %v60_v59  ;;  %456 = vperm.xlu1 %926, %v1053_v11  }
  0x87   :  { %895 = vmatprep.mubr.f32.mxu0 %v61_v60 }
  0x8a   :  { %896 = vmatmul.mubr.f32.gmra.mxu0 %v61_v60  ;;  %928 = vset.pattern.permute.xlu1 %v1005_v14 }
  0x8b   :  { %897 = vmatprep.mubr.f32.mxu0 %v62_v61  ;;  %705 = vperm.xlu1 %928, %v1082_v20  }
  0x8e   :  { %898 = vmatmul.mubr.f32.gmra.mxu0 %v62_v61 }
  0x8f   :  { %899 = vmatprep.mubr.f32.mxu0 %v63_v62  ;;  %709 = vperm.xlu1 %928, %v1065_v15  }
  0x92   :  { %900 = vmatmul.mubr.f32.gmra.mxu0 %v63_v62 }
  0x93   :  { %901 = vmatprep.mubr.f32.mxu0 %v64_v63  ;;  %929 = vset.pattern.permute.xlu1 %v1004_v7  ;;  %v387_v7 = vld [vmem:[#allocation6] sm:$0xff] }
  0x94   :  { %464 = vperm.xlu1 %929, %v1059_v13  }
  0x96   :  { %902 = vmatmul.mubr.f32.gmra.mxu0 %v64_v63 }
  0x97   :  { %903 = vmatprep.mubr.f32.mxu0 %v65_v0 }
  0x98   :  { %931 = vset.pattern.permute.xlu1 %v1005_v14  ;;  %v390_v14 = vld [vmem:[#allocation6 + $0x18] sm:$0xff] }
  0x99   :  { %717 = vperm.xlu1 %931, %v1070_v16   ;;  %v391_v16 = vld [vmem:[#allocation6 + $0x20] sm:$0xff] }
  0x9a   :  { %904 = vmatmul.mubr.f32.gmra.mxu0 %v65_v0 }
  0x9c   :  { %v192_v40 = vpop.permute.xlu0 %191  ;;  %v182_v41 = vpop.permute.xlu1 %181 }
  0x9d   :  { %721 = vperm.xlu1 %931, %v1059_v13   ;;  %v393_v13 = vld [vmem:[#allocation6 + $0x30] sm:$0xff] }
  0xa0   :  { %v187_v36 = vpop.permute.xlu0 %186  ;;  %v177_v44 = vpop.permute.xlu1 %176 }
  0xa4   :  { %v172_v46 = vpop.permute.xlu0 %171  ;;  %v167_v48 = vpop.permute.xlu1 %166 }
  0xa8   :  { %v162_v51 = vpop.permute.xlu0 %161  ;;  %v157_v55 = vpop.permute.xlu1 %156 }
  0xac   :  { %v152_v63 = vpop.permute.xlu0 %151  ;;  %v147_v23 = vpop.permute.xlu1 %146 }
 0x11e   :  { %v1193_v2 = vpop.f32.mrf.mxu0 }
 0x120   :  { %v1195_v3 = vpop.f32.mrf.mxu0 }
 0x122   :  { %v1197_v4 = vpop.f32.mrf.mxu0 }
 0x124   :  { %v1199_v5 = vpop.f32.mrf.mxu0 }
 0x126   :  { %v1201_v6 = vpop.f32.mrf.mxu0 }
 0x128   :  { %v1205_v8 = vpop.f32.mrf.mxu0 }
 0x12a   :  { %v1207_v9 = vpop.f32.mrf.mxu0 }
 0x12c   :  { %v1210_v10 = vpop.f32.mrf.mxu0 }
 0x12e   :  { %v1212_v12 = vpop.f32.mrf.mxu0 }
 0x130   :  { %v1216_v17 = vpop.f32.mrf.mxu0 }
 0x132   :  { %v1220_v18 = vpop.f32.mrf.mxu0 }
 0x134   :  { %v1222_v21 = vpop.f32.mrf.mxu0 }
 0x136   :  { %v1227_v22 = vpop.f32.mrf.mxu0 }
 0x138   :  { %v1229_v25 = vpop.f32.mrf.mxu0 }
 0x13a   :  { %v1233_v26 = vpop.f32.mrf.mxu0 }
 0x13c   :  { %v1236_v29 = vpop.f32.mrf.mxu0 }
 0x13e   :  { %v1239_v30 = vpop.f32.mrf.mxu0 }
 0x140   :  { %v1242_v31 = vpop.f32.mrf.mxu0 }
 0x142   :  { %v1246_v33 = vpop.f32.mrf.mxu0 }
 0x143   :  { %v315_v24 = vadd.f32 %v1246_v33, %v162_v51  ;;  %v303_v33 = vadd.f32 %v1233_v26, %v152_v63 }
 0x144   :  { %v1250_v34 = vpop.f32.mrf.mxu0 }
 0x145   :  { %v369_v26 = vmax.f32 %v303_v33, 0.0 }
 0x146   :  { %v320_v35 = vpop.f32.mrf.mxu0 }
 0x148   :  { %v322_v37 = vpop.f32.mrf.mxu0 }
 0x14a   :  { %v326_v38 = vpop.f32.mrf.mxu0 }
 0x14c   :  { %v328_v39 = vpop.f32.mrf.mxu0 }
 0x14d   :  { %v329_v0 = vadd.f32 %v328_v39, %v172_v46  ;;  %v142_v39 = vpop.permute.xlu0 %141 }
 0x14e   :  { %v332_v42 = vpop.f32.mrf.mxu0  ;;  %v291_v11 = vadd.f32 %v1220_v18, %v142_v39 }
 0x14f   :  { %v333_v61 = vadd.f32 %v332_v42, %v177_v44  ;;  %v317_v42 = vadd.f32 %v1250_v34, %v162_v51  ;;  %v305_v34 = vadd.f32 %v1236_v29, %v152_v63  ;;  %v297_v51 = vadd.f32 %v1227_v22, %v147_v23 }
 0x150   :  { %v334_v43 = vpop.f32.mrf.mxu0  ;;  %v365_v18 = vmax.f32 %v291_v11, 0.0 }
 0x151   :  { %v335_v59 = vadd.f32 %v334_v43, %v177_v44  ;;  %v379_v43 = vmax.f32 %v333_v61, 0.0  ;;  %v370_v29 = vmax.f32 %v305_v34, 0.0 }
 0x152   :  { %v338_v28 = vpop.f32.mrf.mxu0 }
 0x153   :  { %v339_v58 = vadd.f32 %v338_v28, %v182_v41  ;;  %v378_v28 = vmax.f32 %v329_v0, 0.0 }
 0x154   :  { %v340_v45 = vpop.f32.mrf.mxu0 }
 0x155   :  { %v341_v56 = vadd.f32 %v340_v45, %v182_v41  ;;  %v323_v45 = vadd.f32 %v322_v37, %v167_v48  ;;  %v321_v41 = vadd.f32 %v320_v35, %v167_v48  ;;  %v311_v37 = vadd.f32 %v1242_v31, %v157_v55  ;;  %v137_v48 = vpop.permute.xlu1 %136 }
 0x156   :  { %v344_v32 = vpop.f32.mrf.mxu0  ;;  %v309_v35 = vadd.f32 %v1239_v30, %v157_v55  ;;  %v285_v22 = vadd.f32 %v1212_v12, %v137_v48 }
 0x157   :  { %v345_v54 = vadd.f32 %v344_v32, %v187_v36  ;;  %v381_v32 = vmax.f32 %v339_v58, 0.0  ;;  %v376_v44 = vmax.f32 %v323_v45, 0.0  ;;  %v372_v31 = vmax.f32 %v311_v37, 0.0  ;;  %v396_v45 = vld [vmem:[#allocation6 + $0x48] sm:$0xff] }
 0x158   :  { %v346_v47 = vpop.f32.mrf.mxu0  ;;  %v371_v30 = vmax.f32 %v309_v35, 0.0  ;;  %v363_v12 = vmax.f32 %v285_v22, 0.0 }
 0x159   :  { %v347_v52 = vadd.f32 %v346_v47, %v187_v36  ;;  %v383_v62 = vmax.f32 %v345_v54, 0.0  ;;  %v327_v36 = vadd.f32 %v326_v38, %v172_v46  ;;  %v380_v47 = vmax.f32 %v335_v59, 0.0 }
 0x15a   :  { %v350_v27 = vpop.f32.mrf.mxu0  ;;  %v375_v46 = vmax.f32 %v321_v41, 0.0  ;;  %v287_v54 = vadd.f32 %v1216_v17, %v137_v48  ;;  %v398_v41 = vld [vmem:[#allocation6 + $0x58] sm:$0xff] }
 0x15b   :  { %v351_v49 = vadd.f32 %v350_v27, %v192_v40  ;;  %v384_v60 = vmax.f32 %v347_v52, 0.0  ;;  %v377_v38 = vmax.f32 %v327_v36, 0.0  ;;  %v374_v27 = vmax.f32 %v317_v42, 0.0  ;;  %v132_v52 = vpop.permute.xlu0 %131  ;;  %v392_v36 = vld [vmem:[#allocation6 + $0x28] sm:$0xff] }
 0x15c   :  { %v352_v50 = vpop.f32.mrf.mxu0  ;;  %v279_v58 = vadd.f32 %v1207_v9, %v132_v52  ;;  %v364_v17 = vmax.f32 %v287_v54, 0.0  ;;  %v400_v42 = vld [vmem:[#allocation6 + $0x68] sm:$0xff] }
 0x15d   :  { %v353_v53 = vadd.f32 %v352_v50, %v192_v40  ;;  %v385_v19 = vmax.f32 %v351_v49, 0.0  ;;  %v382_v40 = vmax.f32 %v341_v56, 0.0  ;;  %v373_v49 = vmax.f32 %v315_v24, 0.0  ;;  %v402_v24 = vld [vmem:[#allocation6 + $0x78] sm:$0xff] }
 0x15e   :  { %v299_v50 = vadd.f32 %v1229_v25, %v147_v23  ;;  %v127_v25 = vpop.permute.xlu1 %126  ;;  %v367_v56 = vmax.f32 %v297_v51, 0.0  ;;  %v395_v23 = vld [vmem:[#allocation6 + $0x40] sm:$0xff] }
 0x15f   :  { %v386_v57 = vmax.f32 %v353_v53, 0.0  ;;  %v293_v53 = vadd.f32 %v1222_v21, %v142_v39  ;;  %v281_v21 = vadd.f32 %v1210_v10, %v132_v52  ;;  %v122_v20 = vpop.permute.xlu0 %121  ;;  %v273_v59 = vadd.f32 %v1201_v6, %v127_v25 }
 0x160   :  { %v368_v55 = vmax.f32 %v299_v50, 0.0  ;;  %v269_v10 = vadd.f32 %v1199_v5, %v122_v20  ;;  %v267_v9 = vadd.f32 %v1197_v4, %v122_v20 }
 0x161   :  { %467 = vmatprep.subr.mxu1 %v386_v57  ;;  %v366_v57 = vmax.f32 %v293_v53, 0.0  ;;  %v362_v61 = vmax.f32 %v281_v21, 0.0  ;;  %v359_v63 = vmax.f32 %v273_v59, 0.0 }
 0x162   :  { %468 = vmatpush1.msra.mxu1 %v385_v19  ;;  %v275_v19 = vadd.f32 %v1205_v8, %v127_v25  ;;  %v358_v0 = vmax.f32 %v269_v10, 0.0  ;;  %v357_v5 = vmax.f32 %v267_v9, 0.0 }
 0x163   :  { %469 = vmatprep.subr.mxu1 %v384_v60  ;;  %v117_v60 = vpop.permute.xlu1 %116  ;;  %v666_v33 = vpop.permute.xlu0 %665 }
 0x164   :  { %470 = vmatpush1.msra.mxu1 %v383_v62  ;;  %v361_v62 = vmax.f32 %v279_v58, 0.0  ;;  %v263_v15 = vadd.f32 %v1195_v3, %v117_v60  ;;  %v360_v8 = vmax.f32 %v275_v19, 0.0  ;;  %v261_v6 = vadd.f32 %v1193_v2, %v117_v60  ;;  %v388_v2 = vld [vmem:[#allocation6 + $0x8] sm:$0xff]  ;;  %v389_v3 = vld [vmem:[#allocation6 + $0x10] sm:$0xff] }
 0x165   :  { %471 = vmatprep.subr.mxu1 %v382_v40 }
 0x166   :  { %472 = vmatpush1.msra.mxu1 %v381_v32  ;;  %v356_v40 = vmax.f32 %v263_v15, 0.0  ;;  %v355_v4 = vmax.f32 %v261_v6, 0.0  ;;  %v394_v32 = vld [vmem:[#allocation6 + $0x38] sm:$0xff] }
 0x167   :  { %473 = vmatprep.subr.mxu1 %v380_v47  ;;  %v397_v47 = vld [vmem:[#allocation6 + $0x50] sm:$0xff] }
 0x168   :  { %474 = vmatpush1.msra.mxu1 %v379_v43  ;;  %v399_v43 = vld [vmem:[#allocation6 + $0x60] sm:$0xff] }
 0x169   :  { %475 = vmatprep.subr.mxu1 %v378_v28  ;;  %v401_v28 = vld [vmem:[#allocation6 + $0x70] sm:$0xff] }
 0x16a   :  { %476 = vmatpush1.msra.mxu1 %v377_v38  ;;  %v409_v38 = vpop.permute.xlu1 %408 }
 0x16b   :  { %477 = vmatprep.subr.mxu1 %v376_v44 }
 0x16c   :  { %478 = vmatpush1.msra.mxu1 %v375_v46 }
 0x16d   :  { %479 = vmatprep.subr.mxu1 %v374_v27 }
 0x16e   :  { %480 = vmatpush1.msra.mxu1 %v373_v49  ;;  %v413_v39 = vpop.permute.xlu1 %412 }
 0x16f   :  { %481 = vmatprep.subr.mxu1 %v372_v31  ;;  %v1327_v31 = vpop.permute.xlu0 %677 }
 0x170   :  { %482 = vmatpush1.msra.mxu1 %v371_v30 }
 0x171   :  { %483 = vmatprep.subr.mxu1 %v370_v29 }
 0x172   :  { %484 = vmatpush1.msra.mxu1 %v369_v26  ;;  %v662_v37 = vpop.permute.xlu1 %661 }
 0x173   :  { %485 = vmatprep.subr.mxu1 %v368_v55  ;;  %v1331_v29 = vpop.permute.xlu0 %689 }
 0x174   :  { %486 = vmatpush1.msra.mxu1 %v367_v56 }
 0x175   :  { %487 = vmatprep.subr.mxu1 %v366_v57 }
 0x176   :  { %488 = vmatpush1.msra.mxu1 %v365_v18  ;;  %v421_v44 = vpop.permute.xlu1 %420 }
 0x177   :  { %489 = vmatprep.subr.mxu1 %v364_v17  ;;  %v1335_v55 = vpop.permute.xlu0 %701 }
 0x178   :  { %490 = vmatpush1.msra.mxu1 %v363_v12 }
 0x179   :  { %491 = vmatprep.subr.mxu1 %v362_v61 }
 0x17a   :  { %492 = vmatpush1.msra.mxu1 %v361_v62  ;;  %v1315_v35 = vpop.permute.xlu1 %669 }
 0x17b   :  { %493 = vmatprep.subr.mxu1 %v360_v8  ;;  %v405_v58 = vpop.permute.xlu0 %404 }
 0x17c   :  { %494 = vmatpush1.msra.mxu1 %v359_v63 }
 0x17d   :  { %495 = vmatprep.subr.mxu1 %v358_v0 }
 0x17e   :  { %496 = vmatpush1.msra.mxu1 %v357_v5  ;;  %v1317_v46 = vpop.permute.xlu1 %673 }
 0x17f   :  { %497 = vmatprep.subr.mxu1 %v356_v40  ;;  %v417_v12 = vpop.permute.xlu0 %416 }
 0x180   :  { %498 = vmatpush1.msra.mxu1 %v355_v4 }
 0x181   :  { %532 = vmatmul.mubr.f32.vlgmr.msra.gmra.mxu1 %v387_v7 }
 0x182   :  { %537 = vmatprep.mubr.f32.mxu1 %v1003_v1  ;;  %v1319_v48 = vpop.permute.xlu1 %428 }
 0x183   :  { %v425_v0 = vpop.permute.xlu0 %424 }
 0x185   :  { %538 = vmatmul.mubr.f32.gmra.mxu1 %v388_v2 }
 0x186   :  { %543 = vmatprep.mubr.f32.mxu1 %v1003_v1  ;;  %v1321_v34 = vpop.permute.xlu1 %432 }
 0x189   :  { %544 = vmatmul.mubr.f32.gmra.mxu1 %v389_v3 }
 0x18a   :  { %549 = vmatprep.mubr.f32.mxu1 %v1003_v1  ;;  %v1323_v27 = vpop.permute.xlu1 %681 }
 0x18d   :  { %550 = vmatmul.mubr.f32.gmra.mxu1 %v390_v14 }
 0x18e   :  { %555 = vmatprep.mubr.f32.mxu1 %v1003_v1  ;;  %v1325_v50 = vpop.permute.xlu1 %685 }
 0x191   :  { %556 = vmatmul.mubr.f32.gmra.mxu1 %v391_v16 }
 0x192   :  { %561 = vmatprep.mubr.f32.mxu1 %v1003_v1  ;;  %v1329_v52 = vpop.permute.xlu1 %440 }
 0x195   :  { %562 = vmatmul.mubr.f32.gmra.mxu1 %v392_v36 }
 0x196   :  { %567 = vmatprep.mubr.f32.mxu1 %v1003_v1  ;;  %v1333_v25 = vpop.permute.xlu1 %444 }
 0x199   :  { %568 = vmatmul.mubr.f32.gmra.mxu1 %v393_v13 }
 0x19a   :  { %573 = vmatprep.mubr.f32.mxu1 %v1003_v1  ;;  %v1337_v21 = vpop.permute.xlu1 %693 }
 0x19d   :  { %574 = vmatmul.mubr.f32.gmra.mxu1 %v394_v32 }
 0x19e   :  { %579 = vmatprep.mubr.f32.mxu1 %v1003_v1  ;;  %v1339_v17 = vpop.permute.xlu1 %697 }
 0x1a1   :  { %580 = vmatmul.mubr.f32.gmra.mxu1 %v395_v23 }
 0x1a2   :  { %585 = vmatprep.mubr.f32.mxu1 %v1003_v1  ;;  %v1341_v3 = vpop.permute.xlu1 %452 }
 0x1a5   :  { %586 = vmatmul.mubr.f32.gmra.mxu1 %v396_v45 }
 0x1a6   :  { %591 = vmatprep.mubr.f32.mxu1 %v1003_v1 }
 0x1a9   :  { %592 = vmatmul.mubr.f32.gmra.mxu1 %v397_v47 }
 0x1aa   :  { %597 = vmatprep.mubr.f32.mxu1 %v1003_v1 }
 0x1ad   :  { %598 = vmatmul.mubr.f32.gmra.mxu1 %v398_v41 }
 0x1ae   :  { %603 = vmatprep.mubr.f32.mxu1 %v1003_v1 }
 0x1b1   :  { %604 = vmatmul.mubr.f32.gmra.mxu1 %v399_v43 }
 0x1b2   :  { %609 = vmatprep.mubr.f32.mxu1 %v1003_v1 }
 0x1b5   :  { %610 = vmatmul.mubr.f32.gmra.mxu1 %v400_v42 }
 0x1b6   :  { %615 = vmatprep.mubr.f32.mxu1 %v1003_v1 }
 0x1b9   :  { %616 = vmatmul.mubr.f32.gmra.mxu1 %v401_v28 }
 0x1ba   :  { %621 = vmatprep.mubr.f32.mxu1 %v1003_v1 }
 0x1bd   :  { %622 = vmatmul.mubr.f32.gmra.mxu1 %v402_v24 }
 0x241   :  { %v533_v49 = vpop.f32.mrf.mxu1 }
 0x242   :  { %v534_v59 = vadd.f32 %v533_v49, %v405_v58 }
 0x243   :  { %v535_v1 = vpop.f32.mrf.mxu1 }
 0x244   :  { %v536_v9 = vadd.f32 %v535_v1, %v405_v58  ;;  %v628_v63 = vmax.f32 %v534_v59, 0.0  ;;  %v437_v58 = vpop.permute.xlu0 %436 }
 0x245   :  { %v539_v51 = vpop.f32.mrf.mxu1 }
 0x246   :  { %v540_v20 = vadd.f32 %v539_v51, %v409_v38  ;;  %v629_v14 = vmax.f32 %v536_v9, 0.0  ;;  %v724_v45 = vmul.f32 %v662_v37, %v628_v63 }
 0x247   :  { %v541_v30 = vpop.f32.mrf.mxu1 }
 0x248   :  { %v542_v60 = vadd.f32 %v541_v30, %v409_v38  ;;  %v630_v62 = vmax.f32 %v540_v20, 0.0  ;;  %v725_v38 = vmul.f32 %v662_v37, %v629_v14 }
 0x249   :  { %v545_v53 = vpop.f32.mrf.mxu1 }
 0x24a   :  { %v546_v10 = vadd.f32 %v545_v53, %v413_v39  ;;  %v631_v5 = vmax.f32 %v542_v60, 0.0  ;;  %v726_v16 = vmul.f32 %v666_v33, %v630_v62 }
 0x24b   :  { %v547_v11 = vpop.f32.mrf.mxu1 }
 0x24c   :  { %v548_v15 = vadd.f32 %v547_v11, %v413_v39  ;;  %v632_v40 = vmax.f32 %v546_v10, 0.0  ;;  %v727_v41 = vmul.f32 %v666_v33, %v631_v5  ;;  %v756_v1 = vadd.f32 %v726_v16, %v724_v45  ;;  %v1347_v11 = vpop.permute.xlu1 %456 }
 0x24d   :  { %v551_v26 = vpop.f32.mrf.mxu1 }
 0x24e   :  { %v552_v8 = vadd.f32 %v551_v26, %v417_v12  ;;  %v633_v36 = vmax.f32 %v548_v15, 0.0  ;;  %v728_v43 = vmul.f32 %v1315_v35, %v632_v40 }
 0x24f   :  { %v553_v54 = vpop.f32.mrf.mxu1 }
 0x250   :  { %v554_v4 = vadd.f32 %v553_v54, %v417_v12  ;;  %v634_v13 = vmax.f32 %v552_v8, 0.0  ;;  %v729_v51 = vmul.f32 %v1315_v35, %v633_v36 }
 0x251   :  { %v557_v22 = vpop.f32.mrf.mxu1 }
 0x252   :  { %v558_v7 = vadd.f32 %v557_v22, %v421_v44  ;;  %v635_v42 = vmax.f32 %v554_v4, 0.0  ;;  %v730_v30 = vmul.f32 %v1317_v46, %v634_v13  ;;  %v777_v22 = vadd.f32 %v727_v41, %v725_v38 }
 0x253   :  { %v559_v56 = vpop.f32.mrf.mxu1 }
 0x254   :  { %v560_v32 = vadd.f32 %v559_v56, %v421_v44  ;;  %v636_v28 = vmax.f32 %v558_v7, 0.0  ;;  %v757_v56 = vadd.f32 %v756_v1, %v728_v43  ;;  %v731_v37 = vmul.f32 %v1317_v46, %v635_v42 }
 0x255   :  { %v563_v57 = vpop.f32.mrf.mxu1  ;;  %v778_v12 = vadd.f32 %v777_v22, %v729_v51 }
 0x256   :  { %v564_v47 = vadd.f32 %v563_v57, %v425_v0  ;;  %v637_v53 = vmax.f32 %v560_v32, 0.0  ;;  %v732_v57 = vmul.f32 %v1327_v31, %v636_v28  ;;  %v758_v60 = vadd.f32 %v757_v56, %v730_v30  ;;  %v449_v32 = vpop.permute.xlu0 %448 }
 0x257   :  { %v565_v18 = vpop.f32.mrf.mxu1  ;;  %v779_v46 = vadd.f32 %v778_v12, %v731_v37 }
 0x258   :  { %v566_v39 = vadd.f32 %v565_v18, %v425_v0  ;;  %v638_v26 = vmax.f32 %v564_v47, 0.0  ;;  %v733_v10 = vmul.f32 %v1327_v31, %v637_v53  ;;  %v759_v8 = vadd.f32 %v758_v60, %v732_v57  ;;  %v706_v0 = vpop.permute.xlu1 %705 }
 0x259   :  { %v569_v19 = vpop.f32.mrf.mxu1 }
 0x25a   :  { %v570_v49 = vadd.f32 %v569_v19, %v1319_v48  ;;  %v639_v35 = vmax.f32 %v566_v39, 0.0  ;;  %v780_v7 = vadd.f32 %v779_v46, %v733_v10  ;;  %v461_v22 = vpop.permute.xlu0 %460 }
 0x25b   :  { %v571_v61 = vpop.f32.mrf.mxu1 }
 0x25c   :  { %v572_v33 = vadd.f32 %v571_v61, %v1319_v48  ;;  %v640_v20 = vmax.f32 %v570_v49, 0.0  ;;  %v734_v61 = vmul.f32 %v1323_v27, %v638_v26  ;;  %v735_v5 = vmul.f32 %v1323_v27, %v639_v35  ;;  %v710_v49 = vpop.permute.xlu1 %709 }
 0x25d   :  { %v575_v6 = vpop.f32.mrf.mxu1 }
 0x25e   :  { %v576_v54 = vadd.f32 %v575_v6, %v1321_v34  ;;  %v641_v9 = vmax.f32 %v572_v33, 0.0  ;;  %v760_v16 = vadd.f32 %v759_v8, %v734_v61  ;;  %v781_v43 = vadd.f32 %v780_v7, %v735_v5  ;;  %v714_v46 = vpop.permute.xlu0 %713 }
 0x25f   :  { %v577_v2 = vpop.f32.mrf.mxu1 }
 0x260   :  { %v578_v19 = vadd.f32 %v577_v2, %v1321_v34  ;;  %v642_v62 = vmax.f32 %v576_v54, 0.0  ;;  %v736_v34 = vmul.f32 %v1325_v50, %v640_v20  ;;  %v737_v36 = vmul.f32 %v1325_v50, %v641_v9 }
 0x261   :  { %v581_v23 = vpop.f32.mrf.mxu1 }
 0x262   :  { %v582_v59 = vadd.f32 %v581_v23, %v437_v58  ;;  %v643_v40 = vmax.f32 %v578_v19, 0.0  ;;  %v738_v13 = vmul.f32 %v1331_v29, %v642_v62  ;;  %v761_v42 = vadd.f32 %v760_v16, %v736_v34 }
 0x263   :  { %v583_v24 = vpop.f32.mrf.mxu1  ;;  %v782_v1 = vadd.f32 %v781_v43, %v737_v36 }
 0x264   :  { %v584_v15 = vadd.f32 %v583_v24, %v437_v58  ;;  %v644_v4 = vmax.f32 %v582_v59, 0.0  ;;  %v739_v28 = vmul.f32 %v1331_v29, %v643_v40  ;;  %v762_v51 = vadd.f32 %v761_v42, %v738_v13 }
 0x265   :  { %v587_v44 = vpop.f32.mrf.mxu1 }
 0x266   :  { %v588_v6 = vadd.f32 %v587_v44, %v1329_v52  ;;  %v645_v23 = vmax.f32 %v584_v15, 0.0  ;;  %v783_v54 = vadd.f32 %v782_v1, %v739_v28 }
 0x267   :  { %v589_v18 = vpop.f32.mrf.mxu1 }
 0x268   :  { %v590_v31 = vadd.f32 %v589_v18, %v1329_v52  ;;  %v646_v45 = vmax.f32 %v588_v6, 0.0  ;;  %v740_v52 = vmul.f32 %v1337_v21, %v644_v4  ;;  %v741_v30 = vmul.f32 %v1337_v21, %v645_v23  ;;  %v465_v21 = vpop.permute.xlu1 %464 }
 0x269   :  { %v593_v48 = vpop.f32.mrf.mxu1 }
 0x26a   :  { %v594_v2 = vadd.f32 %v593_v48, %v1333_v25  ;;  %v647_v24 = vmax.f32 %v590_v31, 0.0  ;;  %v763_v29 = vadd.f32 %v762_v51, %v740_v52  ;;  %v784_v20 = vadd.f32 %v783_v54, %v741_v30 }
 0x26b   :  { %v595_v63 = vpop.f32.mrf.mxu1  ;;  %v1006_v54 = vmov 1966171168  }
 0x26c   :  { %v596_v27 = vadd.f32 %v595_v63, %v1333_v25  ;;  %v648_v38 = vmax.f32 %v594_v2, 0.0  ;;  %v742_v25 = vmul.f32 %v1339_v17, %v646_v45  ;;  %v743_v37 = vmul.f32 %v1339_v17, %v647_v24  ;;  %v718_v4 = vpop.permute.xlu1 %717 }
 0x26d   :  { %v599_v14 = vpop.f32.mrf.mxu1 }
 0x26e   :  { %v600_v47 = vadd.f32 %v599_v14, %v449_v32  ;;  %v649_v44 = vmax.f32 %v596_v27, 0.0  ;;  %v744_v57 = vmul.f32 %v1335_v55, %v648_v38  ;;  %v764_v59 = vadd.f32 %v763_v29, %v742_v25 }
 0x26f   :  { %v601_v41 = vpop.f32.mrf.mxu1  ;;  %v785_v9 = vadd.f32 %v784_v20, %v743_v37  ;;  %v806_v29 = vunpack.c.l.s4 %v1006_v54 }
 0x270   :  { %v602_v39 = vadd.f32 %v601_v41, %v449_v32  ;;  %v650_v26 = vmax.f32 %v600_v47, 0.0  ;;  %v745_v12 = vmul.f32 %v1335_v55, %v649_v44  ;;  %v765_v17 = vadd.f32 %v764_v59, %v744_v57  ;;  %v722_v42 = vpop.permute.xlu1 %721 }
 0x271   :  { %v605_v50 = vpop.f32.mrf.mxu1 }
 0x272   :  { %v606_v53 = vadd.f32 %v605_v50, %v1341_v3  ;;  %v651_v58 = vmax.f32 %v602_v39, 0.0  ;;  %v746_v60 = vmul.f32 %v706_v0, %v650_v26  ;;  %v786_v5 = vadd.f32 %v785_v9, %v745_v12 }
 0x273   :  { %v607_v33 = vpop.f32.mrf.mxu1 }
 0x274   :  { %v608_v56 = vadd.f32 %v607_v33, %v1341_v3  ;;  %v652_v18 = vmax.f32 %v606_v53, 0.0  ;;  %v747_v62 = vmul.f32 %v706_v0, %v651_v58  ;;  %v766_v34 = vadd.f32 %v765_v17, %v746_v60 }
 0x275   :  { %v611_v35 = vpop.f32.mrf.mxu1 }
 0x276   :  { %v612_v19 = vadd.f32 %v611_v35, %v1347_v11  ;;  %v653_v10 = vmax.f32 %v608_v56, 0.0  ;;  %v748_v15 = vmul.f32 %v710_v49, %v652_v18  ;;  %v787_v14 = vadd.f32 %v786_v5, %v747_v62 }
 0x277   :  { %v613_v48 = vpop.f32.mrf.mxu1  ;;  %v807_v18 = vunpack.c.0.s8 %v806_v29 }
 0x278   :  { %v654_v61 = vmax.f32 %v612_v19, 0.0  ;;  %v614_v3 = vadd.f32 %v613_v48, %v1347_v11  ;;  %v749_v40 = vmul.f32 %v710_v49, %v653_v10  ;;  %v767_v16 = vadd.f32 %v766_v34, %v748_v15 }
 0x279   :  { %v617_v8 = vpop.f32.mrf.mxu1 }
 0x27a   :  { %v655_v6 = vmax.f32 %v614_v3, 0.0  ;;  %v618_v63 = vadd.f32 %v617_v8, %v461_v22  ;;  %v750_v55 = vmul.f32 %v714_v46, %v654_v61  ;;  %v788_v23 = vadd.f32 %v787_v14, %v749_v40 }
 0x27b   :  { %v619_v7 = vpop.f32.mrf.mxu1 }
 0x27c   :  { %v656_v31 = vmax.f32 %v618_v63, 0.0  ;;  %v620_v2 = vadd.f32 %v619_v7, %v461_v22  ;;  %v751_v11 = vmul.f32 %v714_v46, %v655_v6  ;;  %v768_v27 = vadd.f32 %v767_v16, %v750_v55 }
 0x27d   :  { %v623_v36 = vpop.f32.mrf.mxu1  ;;  %v808_v22 = vlaneseq }
 0x27e   :  { %v752_v13 = vmul.f32 %v718_v4, %v656_v31  ;;  %v657_v32 = vmax.f32 %v620_v2, 0.0  ;;  %v624_v0 = vadd.f32 %v623_v36, %v465_v21  ;;  %v789_v28 = vadd.f32 %v788_v23, %v751_v11 }
 0x27f   :  { %v625_v45 = vpop.f32.mrf.mxu1  ;;  %v809_v35 = vshrl.u32 %v808_v22, 7  ;;  %vm822_vm0 = vcmp.lt.s32.totalorder %v808_v22, 256 }
 0x280   :  { %v753_v47 = vmul.f32 %v718_v4, %v657_v32  ;;  %v658_v41 = vmax.f32 %v624_v0, 0.0  ;;  %v626_v43 = vadd.f32 %v625_v45, %v465_v21  ;;  %v769_v52 = vadd.f32 %v768_v27, %v752_v13 }
 0x281   :  { %v799_v21 = vstv %s1385_s4  ;;  %v810_v12 = vsub.s32 %v807_v18, %v809_v35 }
 0x282   :  { %v754_v24 = vmul.f32 %v722_v42, %v658_v41  ;;  %v659_v38 = vmax.f32 %v626_v43, 0.0  ;;  %v790_v39 = vadd.f32 %v789_v28, %v753_v47 }
 0x284   :  { %v770_v49 = vadd.f32 %v769_v52, %v754_v24  ;;  %v755_v50 = vmul.f32 %v722_v42, %v659_v38 }
 0x286   :  { %v771_v1 = vrot.slane %v770_v49, 4  ;;  %v791_v51 = vadd.f32 %v790_v39, %v755_v50 }
 0x288   :  { %v772_v30 = vadd.f32 %v771_v1, %v770_v49  ;;  %v792_v53 = vrot.slane %v791_v51, 4 }
 0x28a   :  { %v773_v25 = vrot.slane %v772_v30, 2  ;;  %v793_v44 = vadd.f32 %v792_v53, %v791_v51 }
 0x28c   :  { %v774_v26 = vadd.f32 %v773_v25, %v772_v30  ;;  %v794_v33 = vrot.slane %v793_v44, 2 }
 0x28e   :  { %v775_v56 = vrot.slane %v774_v26, 1  ;;  %v795_v37 = vadd.f32 %v794_v33, %v793_v44 }
 0x290   :  { %v776_v57 = vadd.f32 %v775_v56, %v774_v26  ;;  %v796_v58 = vrot.slane %v795_v37, 1 }
 0x292   :  { %v797_v20 = vadd.f32 %v796_v58, %v795_v37  ;;  %v800_v19 = vadd.f32 %v799_v21, %v776_v57 }
 0x294   :  { %v801_v59 = vadd.f32 %v799_v21, %v797_v20 }
 0x296   :  { %v804_v60 = vcombine.low %v800_v19, %v801_v59 }
 0x298   :  { %v811_v10 = vrot.slane %v804_v60, %v810_v12 }
 0x29a   :  { %v818_v48 = vrot.slane %v811_v10, %v810_v12 }
 0x29c   :  { %824 = vst.msk [vmem:[#allocation8] sm:$0x3] %vm822_vm0, %v818_v48 }
 0x29d   :  { %983 = shalt.err (!%p980_p0)
}
 0x29e   :  { %834 = dma.vmem_to_hbm [thread:$0]  %s832_s13, 32, %s1386_s5, [#allocation5]  }
 0x29f   :  { %996 = dma.done.wait [#allocation5], 32  }
 0x2a0   :  { %997 = vsyncadd [#allocation5], 4294967264 }
 0x2a1   :  { %838 = vsyncpa [#allocation4], 1 }
 0x2a2   :  { %839 = vsyncpa [#allocation7], 1 }
 0x2a3   :  { %840 = vsyncpa [#allocation5], 1 }

</bundles_post_ra>
